<compile_context>
chip_gen: v6e
topology: v6e:2x2x1
jax: 0.10.0
libtpu: 0.0.40
codegen_flags: <defaults>
</compile_context>

<pallas_src>
import jax
import jax.numpy as jnp
from jax import lax
from jax.experimental import pallas as pl
from jax.experimental.pallas import tpu as pltpu


def cnn_lstm_kernel(x_ref, convw_ref, convb_ref, wih_hbm, whh_hbm, b_ref,
                    fcw_ref, fcb_ref, out_ref,
                    seq_ref, pre_ref, wih_buf, whh_buf, sems):
    _, Bb, Cin = x_ref.shape                # x_ref: (2*Lp + 2, Bb, Cin), zero time halo
    Hp = convw_ref.shape[2]                 # hidden size padded to a lane multiple
    NL = wih_hbm.shape[0]
    Lp = seq_ref.shape[0]
    L2 = 2 * Lp

    # ---- stream layer-0 LSTM weight slabs while the conv phase runs ----
    def fetch_layer(l, slot):
        pltpu.make_async_copy(wih_hbm.at[l], wih_buf.at[slot], sems.at[0, slot]).start()
        pltpu.make_async_copy(whh_hbm.at[l], whh_buf.at[slot], sems.at[1, slot]).start()

    def wait_layer(l, slot):
        pltpu.make_async_copy(wih_hbm.at[l], wih_buf.at[slot], sems.at[0, slot]).wait()
        pltpu.make_async_copy(whh_hbm.at[l], whh_buf.at[slot], sems.at[1, slot]).wait()

    fetch_layer(0, 0)

    # ---- Conv1d(Cin->Hp, k=3, padding=1): 3 shifted MXU dots, no im2col ----
    y = jnp.zeros((L2 * Bb, Hp), jnp.float32)
    for k in range(3):                      # static, tiny
        xk = x_ref[pl.ds(k, L2)].reshape(L2 * Bb, Cin).astype(jnp.bfloat16)
        y = y + jnp.dot(xk, convw_ref[k], preferred_element_type=jnp.float32)
    y = jnp.maximum(y + convb_ref[...], 0.0)

    # ---- MaxPool1d(kernel=2, stride=2) over time: vectorized, one dense store ----
    y3 = y.reshape(Lp, 2 * Bb, Hp)          # rows grouped (pool step, parity, batch)
    seq_ref[...] = jnp.maximum(y3[:, :Bb, :], y3[:, Bb:, :])

    # ---- stacked LSTM, layer-major; gate column order [i, f, o, g], Hp each ----
    zero = jnp.zeros((Bb, Hp), jnp.float32)
    h = zero
    for l in range(NL):                     # NL is small & static
        slot = l & 1
        wait_layer(l, slot)
        if l + 1 < NL:                      # prefetch next layer behind this one
            fetch_layer(l + 1, 1 - slot)
        wih_l = wih_buf[slot]
        whh_l = whh_buf[slot]
        bias_l = b_ref[l]

        # whole-sequence input projection: one big MXU matmul into a scratch
        pre_ref[...] = (
            jnp.dot(seq_ref[...].reshape(Lp * Bb, Hp).astype(jnp.bfloat16),
                    wih_l, preferred_element_type=jnp.float32)
            + bias_l).reshape(Lp, Bb, 4 * Hp)

        # TODO(synk): hold whh_l in the MXU across the time loop with
        # pltpu.matmul_push_rhs/matmul_acc_lhs/matmul_pop, and interleave layer
        # l+1's input projection into this recurrence to fill idle MXU slots.
        def step(t, carry):
            h, c = carry
            gates = pre_ref[t] + jnp.dot(h.astype(jnp.bfloat16), whh_l,
                                         preferred_element_type=jnp.float32)
            s = jax.nn.sigmoid(gates[:, :3 * Hp])     # one sigmoid slab (i, f, o)
            g = jnp.tanh(gates[:, 3 * Hp:])           # one tanh slab (g)
            i = s[:, :Hp]
            f = s[:, Hp:2 * Hp]
            o = s[:, 2 * Hp:]
            c = f * c + i * g
            h = o * jnp.tanh(c)
            seq_ref[t] = h                  # feeds layer l+1's input projection
            return h, c

        h, _ = lax.fori_loop(0, Lp, step, (zero, zero), unroll=min(Lp, 8))

    # ---- final Linear on the last timestep of the top layer ----
    out_ref[...] = (jnp.dot(h.astype(jnp.bfloat16), fcw_ref[...],
                            preferred_element_type=jnp.float32) + fcb_ref[...])


def _pad_to(a, axis, size):
    pads = [(0, 0)] * a.ndim
    pads[axis] = (0, size - a.shape[axis])
    return jnp.pad(a, pads)


def _reorder_pad_gates(w, hp):
    # PyTorch gate column order (i, f, g, o) -> kernel order [i, f, o, g],
    # each gate slab zero-padded to hp lanes so in-kernel slices are lane-aligned.
    i, f, g, o = jnp.split(w, 4, axis=-1)
    return jnp.concatenate([_pad_to(p, -1, hp) for p in (i, f, o, g)], axis=-1)


def cnn_lstm_forward(x, params):
    B, L, Cin = x.shape
    H = params["conv_w"].shape[2]
    O = params["fc_w"].shape[1]
    NL = params["w_ih"].shape[0]
    Lp = L // 2                              # MaxPool1d(2) drops a trailing odd step
    L2 = 2 * Lp
    Hp = max(128, ((H + 127) // 128) * 128)  # lane-aligned hidden size

    # batch padding / grid: two batch blocks when B is large enough so v7x's
    # second TensorCore gets work; a single 8-row block otherwise.
    if B <= 8:
        Bp, n_blocks = 8, 1
    else:
        Bp, n_blocks = ((B + 15) // 16) * 16, 2
    Bb = Bp // n_blocks

    # time-major, batch-padded, single zero time-halo (conv padding=1)
    x_tm = jnp.transpose(x, (1, 0, 2)).astype(jnp.float32)          # (L, B, Cin)
    x_pad = jnp.pad(x_tm, ((1, 1), (0, Bp - B), (0, 0)))[:L2 + 2]   # (L2+2, Bp, Cin)

    # bf16 matmul weights (f32 accumulate in-kernel); biases stay f32.
    # NOTE: conv_w is stored (K, Cin, H); transpose if loading real PyTorch weights.
    conv_w = _pad_to(params["conv_w"], -1, Hp).astype(jnp.bfloat16)      # (3, Cin, Hp)
    conv_b = _pad_to(params["conv_b"], -1, Hp)                           # (1, Hp)
    w_ih = _reorder_pad_gates(_pad_to(params["w_ih"], 1, Hp), Hp).astype(jnp.bfloat16)
    w_hh = _reorder_pad_gates(_pad_to(params["w_hh"], 1, Hp), Hp).astype(jnp.bfloat16)
    b = _reorder_pad_gates(params["b"], Hp)                              # (NL, 1, 4Hp)
    fc_w = _pad_to(params["fc_w"], 0, Hp).astype(jnp.bfloat16)           # (Hp, O)
    fc_b = params["fc_b"]                                                # (1, O)

    # VMEM budget from the actual working set (not a hard-coded 32 MiB).
    nbytes = lambda a: int(a.size) * a.dtype.itemsize
    per_block_in = (nbytes(x_pad) // n_blocks + nbytes(conv_w) + nbytes(conv_b)
                    + nbytes(b) + nbytes(fc_w) + nbytes(fc_b))
    scratch = (Lp * Bb * Hp * 4               # seq_ref
               + Lp * Bb * 4 * Hp * 4         # pre_ref
               + 2 * 2 * Hp * 4 * Hp * 2)     # double-buffered bf16 w_ih/w_hh slabs
    working = 2 * per_block_in + scratch + 2 * Bb * O * 4
    try:
        phys_vmem = pltpu.get_tpu_info().vmem_capacity_bytes
    except Exception:
        phys_vmem = 64 * 1024 * 1024          # v7x per-core VMEM (smallest current gen)
    vmem_limit = int(min(max(working + (4 << 20), 16 << 20), int(phys_vmem * 0.85)))

    vmem_full = lambda shape: pl.BlockSpec(shape, lambda i: (0,) * len(shape))
    out = pl.pallas_call(
        cnn_lstm_kernel,
        out_shape=jax.ShapeDtypeStruct((Bp, O), jnp.float32),
        grid=(n_blocks,),
        in_specs=[
            pl.BlockSpec((L2 + 2, Bb, Cin), lambda i: (0, i, 0)),   # x (batch-blocked)
            vmem_full((3, Cin, Hp)),                                # conv_w
            vmem_full((1, Hp)),                                     # conv_b
            pl.BlockSpec(memory_space=pl.ANY),                      # w_ih (streamed)
            pl.BlockSpec(memory_space=pl.ANY),                      # w_hh (streamed)
            vmem_full((NL, 1, 4 * Hp)),                             # lstm bias
            vmem_full((Hp, O)),                                     # fc_w
            vmem_full((1, O)),                                      # fc_b
        ],
        out_specs=pl.BlockSpec((Bb, O), lambda i: (i, 0)),
        scratch_shapes=[
            pltpu.VMEM((Lp, Bb, Hp), jnp.float32),                  # seq_ref
            pltpu.VMEM((Lp, Bb, 4 * Hp), jnp.float32),              # pre_ref
            pltpu.VMEM((2, Hp, 4 * Hp), jnp.bfloat16),              # w_ih double buffer
            pltpu.VMEM((2, Hp, 4 * Hp), jnp.bfloat16),              # w_hh double buffer
            pltpu.SemaphoreType.DMA((2, 2)),
        ],
        compiler_params=pltpu.CompilerParams(
            dimension_semantics=("parallel",),
            vmem_limit_bytes=vmem_limit),
    )(x_pad, conv_w, conv_b, w_ih, w_hh, b, fc_w, fc_b)
    return out[:B]


def init_params(key, input_size, hidden_size, num_layers, output_size):
    ks = jax.random.split(key, 8)
    kc = 1.0 / (input_size * 3) ** 0.5
    kh = 1.0 / hidden_size ** 0.5
    conv_w = jax.random.uniform(ks[0], (3, input_size, hidden_size),
                                jnp.float32, -kc, kc)                # (K, Cin, H)
    conv_b = jax.random.uniform(ks[1], (1, hidden_size), jnp.float32, -kc, kc)
    # PyTorch LSTM: all layers have input size = hidden_size here (conv out = H).
    # Gate column order is PyTorch's (i, f, g, o); the wrapper permutes/pads.
    w_ih = jax.random.uniform(ks[2], (num_layers, hidden_size, 4 * hidden_size),
                              jnp.float32, -kh, kh)                  # (NL, H, 4H)
    w_hh = jax.random.uniform(ks[3], (num_layers, hidden_size, 4 * hidden_size),
                              jnp.float32, -kh, kh)
    b_ih = jax.random.uniform(ks[4], (num_layers, 1, 4 * hidden_size),
                              jnp.float32, -kh, kh)
    b_hh = jax.random.uniform(ks[5], (num_layers, 1, 4 * hidden_size),
                              jnp.float32, -kh, kh)
    fc_w = jax.random.uniform(ks[6], (hidden_size, output_size), jnp.float32, -kh, kh)
    fc_b = jax.random.uniform(ks[7], (1, output_size), jnp.float32, -kh, kh)
    return dict(conv_w=conv_w, conv_b=conv_b, w_ih=w_ih, w_hh=w_hh,
                b=b_ih + b_hh, fc_w=fc_w, fc_b=fc_b)


def reference_forward(x, params):
    # pure-JAX f32 reference mirroring the PyTorch forward (gate order i, f, g, o)
    B, L, Cin = x.shape
    conv_w = params["conv_w"]
    H = conv_w.shape[2]
    xpad = jnp.pad(x, ((0, 0), (1, 1), (0, 0)))
    y = jnp.zeros((B, L, H), jnp.float32)
    for k in range(3):
        y = y + jnp.einsum('blc,ch->blh', xpad[:, k:k + L, :], conv_w[k])
    y = jax.nn.relu(y + params["conv_b"])
    Lp = L // 2
    y = y[:, :2 * Lp].reshape(B, Lp, 2, H).max(axis=2)
    NL = params["w_ih"].shape[0]
    h = [jnp.zeros((B, H)) for _ in range(NL)]
    c = [jnp.zeros((B, H)) for _ in range(NL)]
    for t in range(Lp):
        inp = y[:, t, :]
        for l in range(NL):
            gates = inp @ params["w_ih"][l] + h[l] @ params["w_hh"][l] + params["b"][l]
            i = jax.nn.sigmoid(gates[:, :H])
            f = jax.nn.sigmoid(gates[:, H:2 * H])
            g = jnp.tanh(gates[:, 2 * H:3 * H])
            o = jax.nn.sigmoid(gates[:, 3 * H:])
            c[l] = f * c[l] + i * g
            h[l] = o * jnp.tanh(c[l])
            inp = h[l]
    return h[-1] @ params["fc_w"] + params["fc_b"]


if __name__ == "__main__":
    B, L, Cin, H, NL, O = 2, 8, 4, 32, 2, 8   # batch, seq_len, input, hidden, layers, out
    key = jax.random.PRNGKey(0)
    kx, kp = jax.random.split(key)
    x = jax.random.normal(kx, (B, L, Cin), jnp.float32)
    params = init_params(kp, Cin, H, NL, O)

    out = jax.block_until_ready(cnn_lstm_forward(x, params))
    assert out.shape == (B, O)

    ref = reference_forward(x, params)
    err = jnp.max(jnp.abs(out - ref))
    # bf16 matmul weights vs. f32 reference -> loosened tolerance
    assert jnp.allclose(out, ref, rtol=3e-2, atol=3e-2), f"max abs err {err}"
    print("KERNEL_OK")
</pallas_src>

<mosaic_0001>
module attributes {stable_mosaic.version = 11 : i64} {
  func.func @cnn_lstm_kernel(%arg0: i32, %arg1: memref<10x8x4xf32, #tpu.memory_space<vmem>>, %arg2: memref<3x4x128xbf16, #tpu.memory_space<vmem>>, %arg3: memref<1x128xf32, #tpu.memory_space<vmem>>, %arg4: memref<2x128x512xbf16, #tpu.memory_space<any>>, %arg5: memref<2x128x512xbf16, #tpu.memory_space<any>>, %arg6: memref<2x1x512xf32, #tpu.memory_space<vmem>>, %arg7: memref<128x8xbf16, #tpu.memory_space<vmem>>, %arg8: memref<1x8xf32, #tpu.memory_space<vmem>>, %arg9: memref<8x8xf32, #tpu.memory_space<vmem>>, %arg10: memref<4x8x128xf32, #tpu.memory_space<vmem>>, %arg11: memref<4x8x512xf32, #tpu.memory_space<vmem>>, %arg12: memref<2x128x512xbf16, #tpu.memory_space<vmem>>, %arg13: memref<2x128x512xbf16, #tpu.memory_space<vmem>>, %arg14: memref<2x2x!tpu.dma_semaphore, #tpu.memory_space<semaphore_mem>>) attributes {dimension_semantics = [#tpu.dimension_semantics<parallel>], iteration_bounds = array<i64: 1>, scalar_prefetch = 0 : i64, scratch_operands = 5 : i64, tpu.core_type = #tpu.core_type<tc>, window_params = [{transform_indices = @transform_0, window_bounds = array<i64: 10, 8, 4>}, {pipeline_mode = #tpu.pipeline_mode<synchronous>, transform_indices = @transform_1, window_bounds = array<i64: 3, 4, 128>}, {pipeline_mode = #tpu.pipeline_mode<synchronous>, transform_indices = @transform_2, window_bounds = array<i64: 1, 128>}, {}, {}, {pipeline_mode = #tpu.pipeline_mode<synchronous>, transform_indices = @transform_5, window_bounds = array<i64: 2, 1, 512>}, {pipeline_mode = #tpu.pipeline_mode<synchronous>, transform_indices = @transform_6, window_bounds = array<i64: 128, 8>}, {pipeline_mode = #tpu.pipeline_mode<synchronous>, transform_indices = @transform_7, window_bounds = array<i64: 1, 8>}, {transform_indices = @transform_8, window_bounds = array<i64: 8, 8>}]} {
    %c0_i32 = arith.constant 0 : i32
    %c0_i32_0 = arith.constant 0 : i32
    %c0_i32_1 = arith.constant 0 : i32
    %c0_i32_2 = arith.constant 0 : i32
    %c0_i32_3 = arith.constant 0 : i32
    %c0_i32_4 = arith.constant 0 : i32
    %0 = tpu.memref_slice %arg4[%c0_i32, %c0_i32_3, %c0_i32_4] : memref<2x128x512xbf16, #tpu.memory_space<any>> -> memref<1x128x512xbf16, #tpu.memory_space<any>>
    %1 = tpu.memref_squeeze %0 : memref<1x128x512xbf16, #tpu.memory_space<any>> -> memref<128x512xbf16, #tpu.memory_space<any>>
    %c0_i32_5 = arith.constant 0 : i32
    %c0_i32_6 = arith.constant 0 : i32
    %2 = tpu.memref_slice %arg12[%c0_i32_0, %c0_i32_5, %c0_i32_6] : memref<2x128x512xbf16, #tpu.memory_space<vmem>> -> memref<1x128x512xbf16, #tpu.memory_space<vmem>>
    %3 = tpu.memref_squeeze %2 : memref<1x128x512xbf16, #tpu.memory_space<vmem>> -> memref<128x512xbf16, #tpu.memory_space<vmem>>
    %4 = tpu.memref_slice %arg14[%c0_i32_1, %c0_i32_2] : memref<2x2x!tpu.dma_semaphore, #tpu.memory_space<semaphore_mem>> -> memref<1x1x!tpu.dma_semaphore, #tpu.memory_space<semaphore_mem>>
    %5 = tpu.memref_squeeze %4 : memref<1x1x!tpu.dma_semaphore, #tpu.memory_space<semaphore_mem>> -> memref<!tpu.dma_semaphore, #tpu.memory_space<semaphore_mem>>
    tpu.enqueue_dma source(%1 : memref<128x512xbf16, #tpu.memory_space<any>>) target(%3 : memref<128x512xbf16, #tpu.memory_space<vmem>>) target_semaphore(%5 : memref<!tpu.dma_semaphore, #tpu.memory_space<semaphore_mem>>)
    %c0_i32_7 = arith.constant 0 : i32
    %c0_i32_8 = arith.constant 0 : i32
    %c1_i32 = arith.constant 1 : i32
    %c0_i32_9 = arith.constant 0 : i32
    %c0_i32_10 = arith.constant 0 : i32
    %c0_i32_11 = arith.constant 0 : i32
    %6 = tpu.memref_slice %arg5[%c0_i32_7, %c0_i32_10, %c0_i32_11] : memref<2x128x512xbf16, #tpu.memory_space<any>> -> memref<1x128x512xbf16, #tpu.memory_space<any>>
    %7 = tpu.memref_squeeze %6 : memref<1x128x512xbf16, #tpu.memory_space<any>> -> memref<128x512xbf16, #tpu.memory_space<any>>
    %c0_i32_12 = arith.constant 0 : i32
    %c0_i32_13 = arith.constant 0 : i32
    %8 = tpu.memref_slice %arg13[%c0_i32_8, %c0_i32_12, %c0_i32_13] : memref<2x128x512xbf16, #tpu.memory_space<vmem>> -> memref<1x128x512xbf16, #tpu.memory_space<vmem>>
    %9 = tpu.memref_squeeze %8 : memref<1x128x512xbf16, #tpu.memory_space<vmem>> -> memref<128x512xbf16, #tpu.memory_space<vmem>>
    %10 = tpu.memref_slice %arg14[%c1_i32, %c0_i32_9] : memref<2x2x!tpu.dma_semaphore, #tpu.memory_space<semaphore_mem>> -> memref<1x1x!tpu.dma_semaphore, #tpu.memory_space<semaphore_mem>>
    %11 = tpu.memref_squeeze %10 : memref<1x1x!tpu.dma_semaphore, #tpu.memory_space<semaphore_mem>> -> memref<!tpu.dma_semaphore, #tpu.memory_space<semaphore_mem>>
    tpu.enqueue_dma source(%7 : memref<128x512xbf16, #tpu.memory_space<any>>) target(%9 : memref<128x512xbf16, #tpu.memory_space<vmem>>) target_semaphore(%11 : memref<!tpu.dma_semaphore, #tpu.memory_space<semaphore_mem>>)
    %cst = arith.constant 0.000000e+00 : f32
    %12 = vector.broadcast %cst : f32 to vector<64x128xf32>
    %c0 = arith.constant 0 : index
    %c0_14 = arith.constant 0 : index
    %c0_15 = arith.constant 0 : index
    %13 = vector.load %arg1[%c0, %c0_14, %c0_15] : memref<10x8x4xf32, #tpu.memory_space<vmem>>, vector<8x8x4xf32>
    %14 = vector.shape_cast %13 : vector<8x8x4xf32> to vector<64x4xf32>
    %15 = arith.truncf %14 : vector<64x4xf32> to vector<64x4xbf16>
    %c0_16 = arith.constant 0 : index
    %c0_17 = arith.constant 0 : index
    %c0_18 = arith.constant 0 : index
    %16 = vector.load %arg2[%c0_16, %c0_17, %c0_18] : memref<3x4x128xbf16, #tpu.memory_space<vmem>>, vector<1x4x128xbf16>
    %17 = vector.shape_cast %16 : vector<1x4x128xbf16> to vector<4x128xbf16>
    %cst_19 = arith.constant dense<0.000000e+00> : vector<64x128xf32>
    %18 = tpu.matmul %15, %17, %cst_19 {dimension_numbers = #tpu.dot_dimension_numbers<[1], [0], [0], [1], [0, 0, 1, 1], [], []>} : vector<64x4xbf16>, vector<4x128xbf16>, vector<64x128xf32> -> vector<64x128xf32>
    %19 = arith.addf %12, %18 : vector<64x128xf32>
    %c1 = arith.constant 1 : index
    %c0_20 = arith.constant 0 : index
    %c0_21 = arith.constant 0 : index
    %20 = vector.load %arg1[%c1, %c0_20, %c0_21] : memref<10x8x4xf32, #tpu.memory_space<vmem>>, vector<8x8x4xf32>
    %21 = vector.shape_cast %20 : vector<8x8x4xf32> to vector<64x4xf32>
    %22 = arith.truncf %21 : vector<64x4xf32> to vector<64x4xbf16>
    %c1_22 = arith.constant 1 : index
    %c0_23 = arith.constant 0 : index
    %c0_24 = arith.constant 0 : index
    %23 = vector.load %arg2[%c1_22, %c0_23, %c0_24] : memref<3x4x128xbf16, #tpu.memory_space<vmem>>, vector<1x4x128xbf16>
    %24 = vector.shape_cast %23 : vector<1x4x128xbf16> to vector<4x128xbf16>
    %cst_25 = arith.constant dense<0.000000e+00> : vector<64x128xf32>
    %25 = tpu.matmul %22, %24, %cst_25 {dimension_numbers = #tpu.dot_dimension_numbers<[1], [0], [0], [1], [0, 0, 1, 1], [], []>} : vector<64x4xbf16>, vector<4x128xbf16>, vector<64x128xf32> -> vector<64x128xf32>
    %26 = arith.addf %19, %25 : vector<64x128xf32>
    %c2 = arith.constant 2 : index
    %c0_26 = arith.constant 0 : index
    %c0_27 = arith.constant 0 : index
    %27 = vector.load %arg1[%c2, %c0_26, %c0_27] : memref<10x8x4xf32, #tpu.memory_space<vmem>>, vector<8x8x4xf32>
    %28 = vector.shape_cast %27 : vector<8x8x4xf32> to vector<64x4xf32>
    %29 = arith.truncf %28 : vector<64x4xf32> to vector<64x4xbf16>
    %c2_28 = arith.constant 2 : index
    %c0_29 = arith.constant 0 : index
    %c0_30 = arith.constant 0 : index
    %30 = vector.load %arg2[%c2_28, %c0_29, %c0_30] : memref<3x4x128xbf16, #tpu.memory_space<vmem>>, vector<1x4x128xbf16>
    %31 = vector.shape_cast %30 : vector<1x4x128xbf16> to vector<4x128xbf16>
    %cst_31 = arith.constant dense<0.000000e+00> : vector<64x128xf32>
    %32 = tpu.matmul %29, %31, %cst_31 {dimension_numbers = #tpu.dot_dimension_numbers<[1], [0], [0], [1], [0, 0, 1, 1], [], []>} : vector<64x4xbf16>, vector<4x128xbf16>, vector<64x128xf32> -> vector<64x128xf32>
    %33 = arith.addf %26, %32 : vector<64x128xf32>
    %c0_32 = arith.constant 0 : index
    %c0_33 = arith.constant 0 : index
    %34 = vector.load %arg3[%c0_32, %c0_33] : memref<1x128xf32, #tpu.memory_space<vmem>>, vector<1x128xf32>
    %35 = vector.broadcast %34 : vector<1x128xf32> to vector<64x128xf32>
    %36 = arith.addf %33, %35 : vector<64x128xf32>
    %cst_34 = arith.constant 0.000000e+00 : f32
    %37 = vector.broadcast %cst_34 : f32 to vector<64x128xf32>
    %38 = arith.maximumf %36, %37 : vector<64x128xf32>
    %39 = vector.shape_cast %38 : vector<64x128xf32> to vector<4x16x128xf32>
    %40 = vector.extract_strided_slice %39 {offsets = [0, 0, 0], sizes = [4, 8, 128], strides = [1, 1, 1]} : vector<4x16x128xf32> to vector<4x8x128xf32>
    %41 = vector.extract_strided_slice %39 {offsets = [0, 8, 0], sizes = [4, 8, 128], strides = [1, 1, 1]} : vector<4x16x128xf32> to vector<4x8x128xf32>
    %42 = arith.maximumf %40, %41 : vector<4x8x128xf32>
    %c0_35 = arith.constant 0 : index
    %c0_36 = arith.constant 0 : index
    %c0_37 = arith.constant 0 : index
    %43 = vector.load %arg10[%c0_35, %c0_36, %c0_37] : memref<4x8x128xf32, #tpu.memory_space<vmem>>, vector<4x8x128xf32>
    tpu.vector_store %arg10[%c0_35, %c0_36, %c0_37], %42 {strides = array<i32>} : memref<4x8x128xf32, #tpu.memory_space<vmem>>, vector<4x8x128xf32>,
    %cst_38 = arith.constant 0.000000e+00 : f32
    %44 = vector.broadcast %cst_38 : f32 to vector<8x128xf32>
    %c0_i32_39 = arith.constant 0 : i32
    %c0_i32_40 = arith.constant 0 : i32
    %c0_i32_41 = arith.constant 0 : i32
    %c0_i32_42 = arith.constant 0 : i32
    %c0_i32_43 = arith.constant 0 : i32
    %c0_i32_44 = arith.constant 0 : i32
    %45 = tpu.memref_slice %arg4[%c0_i32_39, %c0_i32_43, %c0_i32_44] : memref<2x128x512xbf16, #tpu.memory_space<any>> -> memref<1x128x512xbf16, #tpu.memory_space<any>>
    %46 = tpu.memref_squeeze %45 : memref<1x128x512xbf16, #tpu.memory_space<any>> -> memref<128x512xbf16, #tpu.memory_space<any>>
    %c0_i32_45 = arith.constant 0 : i32
    %c0_i32_46 = arith.constant 0 : i32
    %47 = tpu.memref_slice %arg12[%c0_i32_40, %c0_i32_45, %c0_i32_46] : memref<2x128x512xbf16, #tpu.memory_space<vmem>> -> memref<1x128x512xbf16, #tpu.memory_space<vmem>>
    %48 = tpu.memref_squeeze %47 : memref<1x128x512xbf16, #tpu.memory_space<vmem>> -> memref<128x512xbf16, #tpu.memory_space<vmem>>
    %49 = tpu.memref_slice %arg14[%c0_i32_41, %c0_i32_42] : memref<2x2x!tpu.dma_semaphore, #tpu.memory_space<semaphore_mem>> -> memref<1x1x!tpu.dma_semaphore, #tpu.memory_space<semaphore_mem>>
    %50 = tpu.memref_squeeze %49 : memref<1x1x!tpu.dma_semaphore, #tpu.memory_space<semaphore_mem>> -> memref<!tpu.dma_semaphore, #tpu.memory_space<semaphore_mem>>
    tpu.wait_dma2 semaphore(%50 : memref<!tpu.dma_semaphore, #tpu.memory_space<semaphore_mem>>) src(%46 : memref<128x512xbf16, #tpu.memory_space<any>>) dst(%48 : memref<128x512xbf16, #tpu.memory_space<vmem>>)
    %c0_i32_47 = arith.constant 0 : i32
    %c0_i32_48 = arith.constant 0 : i32
    %c1_i32_49 = arith.constant 1 : i32
    %c0_i32_50 = arith.constant 0 : i32
    %c0_i32_51 = arith.constant 0 : i32
    %c0_i32_52 = arith.constant 0 : i32
    %51 = tpu.memref_slice %arg5[%c0_i32_47, %c0_i32_51, %c0_i32_52] : memref<2x128x512xbf16, #tpu.memory_space<any>> -> memref<1x128x512xbf16, #tpu.memory_space<any>>
    %52 = tpu.memref_squeeze %51 : memref<1x128x512xbf16, #tpu.memory_space<any>> -> memref<128x512xbf16, #tpu.memory_space<any>>
    %c0_i32_53 = arith.constant 0 : i32
    %c0_i32_54 = arith.constant 0 : i32
    %53 = tpu.memref_slice %arg13[%c0_i32_48, %c0_i32_53, %c0_i32_54] : memref<2x128x512xbf16, #tpu.memory_space<vmem>> -> memref<1x128x512xbf16, #tpu.memory_space<vmem>>
    %54 = tpu.memref_squeeze %53 : memref<1x128x512xbf16, #tpu.memory_space<vmem>> -> memref<128x512xbf16, #tpu.memory_space<vmem>>
    %55 = tpu.memref_slice %arg14[%c1_i32_49, %c0_i32_50] : memref<2x2x!tpu.dma_semaphore, #tpu.memory_space<semaphore_mem>> -> memref<1x1x!tpu.dma_semaphore, #tpu.memory_space<semaphore_mem>>
    %56 = tpu.memref_squeeze %55 : memref<1x1x!tpu.dma_semaphore, #tpu.memory_space<semaphore_mem>> -> memref<!tpu.dma_semaphore, #tpu.memory_space<semaphore_mem>>
    tpu.wait_dma2 semaphore(%56 : memref<!tpu.dma_semaphore, #tpu.memory_space<semaphore_mem>>) src(%52 : memref<128x512xbf16, #tpu.memory_space<any>>) dst(%54 : memref<128x512xbf16, #tpu.memory_space<vmem>>)
    %c1_i32_55 = arith.constant 1 : i32
    %c1_i32_56 = arith.constant 1 : i32
    %c0_i32_57 = arith.constant 0 : i32
    %c1_i32_58 = arith.constant 1 : i32
    %c0_i32_59 = arith.constant 0 : i32
    %c0_i32_60 = arith.constant 0 : i32
    %57 = tpu.memref_slice %arg4[%c1_i32_55, %c0_i32_59, %c0_i32_60] : memref<2x128x512xbf16, #tpu.memory_space<any>> -> memref<1x128x512xbf16, #tpu.memory_space<any>>
    %58 = tpu.memref_squeeze %57 : memref<1x128x512xbf16, #tpu.memory_space<any>> -> memref<128x512xbf16, #tpu.memory_space<any>>
    %c0_i32_61 = arith.constant 0 : i32
    %c0_i32_62 = arith.constant 0 : i32
    %59 = tpu.memref_slice %arg12[%c1_i32_56, %c0_i32_61, %c0_i32_62] : memref<2x128x512xbf16, #tpu.memory_space<vmem>> -> memref<1x128x512xbf16, #tpu.memory_space<vmem>>
    %60 = tpu.memref_squeeze %59 : memref<1x128x512xbf16, #tpu.memory_space<vmem>> -> memref<128x512xbf16, #tpu.memory_space<vmem>>
    %61 = tpu.memref_slice %arg14[%c0_i32_57, %c1_i32_58] : memref<2x2x!tpu.dma_semaphore, #tpu.memory_space<semaphore_mem>> -> memref<1x1x!tpu.dma_semaphore, #tpu.memory_space<semaphore_mem>>
    %62 = tpu.memref_squeeze %61 : memref<1x1x!tpu.dma_semaphore, #tpu.memory_space<semaphore_mem>> -> memref<!tpu.dma_semaphore, #tpu.memory_space<semaphore_mem>>
    tpu.enqueue_dma source(%58 : memref<128x512xbf16, #tpu.memory_space<any>>) target(%60 : memref<128x512xbf16, #tpu.memory_space<vmem>>) target_semaphore(%62 : memref<!tpu.dma_semaphore, #tpu.memory_space<semaphore_mem>>)
    %c1_i32_63 = arith.constant 1 : i32
    %c1_i32_64 = arith.constant 1 : i32
    %c1_i32_65 = arith.constant 1 : i32
    %c1_i32_66 = arith.constant 1 : i32
    %c0_i32_67 = arith.constant 0 : i32
    %c0_i32_68 = arith.constant 0 : i32
    %63 = tpu.memref_slice %arg5[%c1_i32_63, %c0_i32_67, %c0_i32_68] : memref<2x128x512xbf16, #tpu.memory_space<any>> -> memref<1x128x512xbf16, #tpu.memory_space<any>>
    %64 = tpu.memref_squeeze %63 : memref<1x128x512xbf16, #tpu.memory_space<any>> -> memref<128x512xbf16, #tpu.memory_space<any>>
    %c0_i32_69 = arith.constant 0 : i32
    %c0_i32_70 = arith.constant 0 : i32
    %65 = tpu.memref_slice %arg13[%c1_i32_64, %c0_i32_69, %c0_i32_70] : memref<2x128x512xbf16, #tpu.memory_space<vmem>> -> memref<1x128x512xbf16, #tpu.memory_space<vmem>>
    %66 = tpu.memref_squeeze %65 : memref<1x128x512xbf16, #tpu.memory_space<vmem>> -> memref<128x512xbf16, #tpu.memory_space<vmem>>
    %67 = tpu.memref_slice %arg14[%c1_i32_65, %c1_i32_66] : memref<2x2x!tpu.dma_semaphore, #tpu.memory_space<semaphore_mem>> -> memref<1x1x!tpu.dma_semaphore, #tpu.memory_space<semaphore_mem>>
    %68 = tpu.memref_squeeze %67 : memref<1x1x!tpu.dma_semaphore, #tpu.memory_space<semaphore_mem>> -> memref<!tpu.dma_semaphore, #tpu.memory_space<semaphore_mem>>
    tpu.enqueue_dma source(%64 : memref<128x512xbf16, #tpu.memory_space<any>>) target(%66 : memref<128x512xbf16, #tpu.memory_space<vmem>>) target_semaphore(%68 : memref<!tpu.dma_semaphore, #tpu.memory_space<semaphore_mem>>)
    %c0_71 = arith.constant 0 : index
    %c0_72 = arith.constant 0 : index
    %c0_73 = arith.constant 0 : index
    %69 = vector.load %arg12[%c0_71, %c0_72, %c0_73] : memref<2x128x512xbf16, #tpu.memory_space<vmem>>, vector<1x128x512xbf16>
    %70 = vector.shape_cast %69 : vector<1x128x512xbf16> to vector<128x512xbf16>
    %c0_74 = arith.constant 0 : index
    %c0_75 = arith.constant 0 : index
    %c0_76 = arith.constant 0 : index
    %71 = vector.load %arg13[%c0_74, %c0_75, %c0_76] : memref<2x128x512xbf16, #tpu.memory_space<vmem>>, vector<1x128x512xbf16>
    %72 = vector.shape_cast %71 : vector<1x128x512xbf16> to vector<128x512xbf16>
    %c0_77 = arith.constant 0 : index
    %c0_78 = arith.constant 0 : index
    %c0_79 = arith.constant 0 : index
    %73 = vector.load %arg6[%c0_77, %c0_78, %c0_79] : memref<2x1x512xf32, #tpu.memory_space<vmem>>, vector<1x1x512xf32>
    %74 = vector.shape_cast %73 : vector<1x1x512xf32> to vector<1x512xf32>
    %c0_80 = arith.constant 0 : index
    %c0_81 = arith.constant 0 : index
    %c0_82 = arith.constant 0 : index
    %75 = vector.load %arg10[%c0_80, %c0_81, %c0_82] : memref<4x8x128xf32, #tpu.memory_space<vmem>>, vector<4x8x128xf32>
    %76 = vector.shape_cast %75 : vector<4x8x128xf32> to vector<32x128xf32>
    %77 = arith.truncf %76 : vector<32x128xf32> to vector<32x128xbf16>
    %cst_83 = arith.constant dense<0.000000e+00> : vector<32x512xf32>
    %78 = tpu.matmul %77, %70, %cst_83 {dimension_numbers = #tpu.dot_dimension_numbers<[1], [0], [0], [1], [0, 0, 1, 1], [], []>} : vector<32x128xbf16>, vector<128x512xbf16>, vector<32x512xf32> -> vector<32x512xf32>
    %79 = vector.broadcast %74 : vector<1x512xf32> to vector<32x512xf32>
    %80 = arith.addf %78, %79 : vector<32x512xf32>
    %81 = vector.shape_cast %80 : vector<32x512xf32> to vector<4x8x512xf32>
    %c0_84 = arith.constant 0 : index
    %c0_85 = arith.constant 0 : index
    %c0_86 = arith.constant 0 : index
    %82 = vector.load %arg11[%c0_84, %c0_85, %c0_86] : memref<4x8x512xf32, #tpu.memory_space<vmem>>, vector<4x8x512xf32>
    tpu.vector_store %arg11[%c0_84, %c0_85, %c0_86], %81 {strides = array<i32>} : memref<4x8x512xf32, #tpu.memory_space<vmem>>, vector<4x8x512xf32>,
    %c0_i32_87 = arith.constant 0 : i32
    %83 = arith.index_cast %c0_i32_87 : i32 to index
    %c0_88 = arith.constant 0 : index
    %c0_89 = arith.constant 0 : index
    %84 = vector.load %arg11[%83, %c0_88, %c0_89] : memref<4x8x512xf32, #tpu.memory_space<vmem>>, vector<1x8x512xf32>
    %85 = vector.shape_cast %84 : vector<1x8x512xf32> to vector<8x512xf32>
    %86 = arith.truncf %44 : vector<8x128xf32> to vector<8x128xbf16>
    %cst_90 = arith.constant dense<0.000000e+00> : vector<8x512xf32>
    %87 = tpu.matmul %86, %72, %cst_90 {dimension_numbers = #tpu.dot_dimension_numbers<[1], [0], [0], [1], [0, 0, 1, 1], [], []>} : vector<8x128xbf16>, vector<128x512xbf16>, vector<8x512xf32> -> vector<8x512xf32>
    %88 = arith.addf %85, %87 : vector<8x512xf32>
    %89 = vector.extract_strided_slice %88 {offsets = [0, 0], sizes = [8, 384], strides = [1, 1]} : vector<8x512xf32> to vector<8x384xf32>
    %90 = arith.negf %89 : vector<8x384xf32>
    %91 = math.exp %90 : vector<8x384xf32>
    %cst_91 = arith.constant 1.000000e+00 : f32
    %92 = vector.broadcast %cst_91 : f32 to vector<8x384xf32>
    %93 = arith.addf %92, %91 : vector<8x384xf32>
    %94 = arith.divf %92, %93 : vector<8x384xf32>
    %95 = vector.extract_strided_slice %88 {offsets = [0, 384], sizes = [8, 128], strides = [1, 1]} : vector<8x512xf32> to vector<8x128xf32>
    %96 = math.tanh %95 : vector<8x128xf32>
    %97 = vector.extract_strided_slice %94 {offsets = [0, 0], sizes = [8, 128], strides = [1, 1]} : vector<8x384xf32> to vector<8x128xf32>
    %98 = vector.extract_strided_slice %94 {offsets = [0, 128], sizes = [8, 128], strides = [1, 1]} : vector<8x384xf32> to vector<8x128xf32>
    %99 = vector.extract_strided_slice %94 {offsets = [0, 256], sizes = [8, 128], strides = [1, 1]} : vector<8x384xf32> to vector<8x128xf32>
    %100 = arith.mulf %98, %44 : vector<8x128xf32>
    %101 = arith.mulf %97, %96 : vector<8x128xf32>
    %102 = arith.addf %100, %101 : vector<8x128xf32>
    %103 = math.tanh %102 : vector<8x128xf32>
    %104 = arith.mulf %99, %103 : vector<8x128xf32>
    %105 = arith.index_cast %c0_i32_87 : i32 to index
    %c0_92 = arith.constant 0 : index
    %c0_93 = arith.constant 0 : index
    %106 = vector.load %arg10[%105, %c0_92, %c0_93] : memref<4x8x128xf32, #tpu.memory_space<vmem>>, vector<1x8x128xf32>
    %107 = vector.shape_cast %106 : vector<1x8x128xf32> to vector<8x128xf32>
    %108 = vector.shape_cast %104 : vector<8x128xf32> to vector<1x8x128xf32>
    tpu.vector_store %arg10[%105, %c0_92, %c0_93], %108 {strides = array<i32>} : memref<4x8x128xf32, #tpu.memory_space<vmem>>, vector<1x8x128xf32>,
    %c1_i32_94 = arith.constant 1 : i32
    %109 = arith.index_cast %c1_i32_94 : i32 to index
    %c0_95 = arith.constant 0 : index
    %c0_96 = arith.constant 0 : index
    %110 = vector.load %arg11[%109, %c0_95, %c0_96] : memref<4x8x512xf32, #tpu.memory_space<vmem>>, vector<1x8x512xf32>
    %111 = vector.shape_cast %110 : vector<1x8x512xf32> to vector<8x512xf32>
    %112 = arith.truncf %104 : vector<8x128xf32> to vector<8x128xbf16>
    %cst_97 = arith.constant dense<0.000000e+00> : vector<8x512xf32>
    %113 = tpu.matmul %112, %72, %cst_97 {dimension_numbers = #tpu.dot_dimension_numbers<[1], [0], [0], [1], [0, 0, 1, 1], [], []>} : vector<8x128xbf16>, vector<128x512xbf16>, vector<8x512xf32> -> vector<8x512xf32>
    %114 = arith.addf %111, %113 : vector<8x512xf32>
    %115 = vector.extract_strided_slice %114 {offsets = [0, 0], sizes = [8, 384], strides = [1, 1]} : vector<8x512xf32> to vector<8x384xf32>
    %116 = arith.negf %115 : vector<8x384xf32>
    %117 = math.exp %116 : vector<8x384xf32>
    %cst_98 = arith.constant 1.000000e+00 : f32
    %118 = vector.broadcast %cst_98 : f32 to vector<8x384xf32>
    %119 = arith.addf %118, %117 : vector<8x384xf32>
    %120 = arith.divf %118, %119 : vector<8x384xf32>
    %121 = vector.extract_strided_slice %114 {offsets = [0, 384], sizes = [8, 128], strides = [1, 1]} : vector<8x512xf32> to vector<8x128xf32>
    %122 = math.tanh %121 : vector<8x128xf32>
    %123 = vector.extract_strided_slice %120 {offsets = [0, 0], sizes = [8, 128], strides = [1, 1]} : vector<8x384xf32> to vector<8x128xf32>
    %124 = vector.extract_strided_slice %120 {offsets = [0, 128], sizes = [8, 128], strides = [1, 1]} : vector<8x384xf32> to vector<8x128xf32>
    %125 = vector.extract_strided_slice %120 {offsets = [0, 256], sizes = [8, 128], strides = [1, 1]} : vector<8x384xf32> to vector<8x128xf32>
    %126 = arith.mulf %124, %102 : vector<8x128xf32>
    %127 = arith.mulf %123, %122 : vector<8x128xf32>
    %128 = arith.addf %126, %127 : vector<8x128xf32>
    %129 = math.tanh %128 : vector<8x128xf32>
    %130 = arith.mulf %125, %129 : vector<8x128xf32>
    %131 = arith.index_cast %c1_i32_94 : i32 to index
    %c0_99 = arith.constant 0 : index
    %c0_100 = arith.constant 0 : index
    %132 = vector.load %arg10[%131, %c0_99, %c0_100] : memref<4x8x128xf32, #tpu.memory_space<vmem>>, vector<1x8x128xf32>
    %133 = vector.shape_cast %132 : vector<1x8x128xf32> to vector<8x128xf32>
    %134 = vector.shape_cast %130 : vector<8x128xf32> to vector<1x8x128xf32>
    tpu.vector_store %arg10[%131, %c0_99, %c0_100], %134 {strides = array<i32>} : memref<4x8x128xf32, #tpu.memory_space<vmem>>, vector<1x8x128xf32>,
    %c2_i32 = arith.constant 2 : i32
    %135 = arith.index_cast %c2_i32 : i32 to index
    %c0_101 = arith.constant 0 : index
    %c0_102 = arith.constant 0 : index
    %136 = vector.load %arg11[%135, %c0_101, %c0_102] : memref<4x8x512xf32, #tpu.memory_space<vmem>>, vector<1x8x512xf32>
    %137 = vector.shape_cast %136 : vector<1x8x512xf32> to vector<8x512xf32>
    %138 = arith.truncf %130 : vector<8x128xf32> to vector<8x128xbf16>
    %cst_103 = arith.constant dense<0.000000e+00> : vector<8x512xf32>
    %139 = tpu.matmul %138, %72, %cst_103 {dimension_numbers = #tpu.dot_dimension_numbers<[1], [0], [0], [1], [0, 0, 1, 1], [], []>} : vector<8x128xbf16>, vector<128x512xbf16>, vector<8x512xf32> -> vector<8x512xf32>
    %140 = arith.addf %137, %139 : vector<8x512xf32>
    %141 = vector.extract_strided_slice %140 {offsets = [0, 0], sizes = [8, 384], strides = [1, 1]} : vector<8x512xf32> to vector<8x384xf32>
    %142 = arith.negf %141 : vector<8x384xf32>
    %143 = math.exp %142 : vector<8x384xf32>
    %cst_104 = arith.constant 1.000000e+00 : f32
    %144 = vector.broadcast %cst_104 : f32 to vector<8x384xf32>
    %145 = arith.addf %144, %143 : vector<8x384xf32>
    %146 = arith.divf %144, %145 : vector<8x384xf32>
    %147 = vector.extract_strided_slice %140 {offsets = [0, 384], sizes = [8, 128], strides = [1, 1]} : vector<8x512xf32> to vector<8x128xf32>
    %148 = math.tanh %147 : vector<8x128xf32>
    %149 = vector.extract_strided_slice %146 {offsets = [0, 0], sizes = [8, 128], strides = [1, 1]} : vector<8x384xf32> to vector<8x128xf32>
    %150 = vector.extract_strided_slice %146 {offsets = [0, 128], sizes = [8, 128], strides = [1, 1]} : vector<8x384xf32> to vector<8x128xf32>
    %151 = vector.extract_strided_slice %146 {offsets = [0, 256], sizes = [8, 128], strides = [1, 1]} : vector<8x384xf32> to vector<8x128xf32>
    %152 = arith.mulf %150, %128 : vector<8x128xf32>
    %153 = arith.mulf %149, %148 : vector<8x128xf32>
    %154 = arith.addf %152, %153 : vector<8x128xf32>
    %155 = math.tanh %154 : vector<8x128xf32>
    %156 = arith.mulf %151, %155 : vector<8x128xf32>
    %157 = arith.index_cast %c2_i32 : i32 to index
    %c0_105 = arith.constant 0 : index
    %c0_106 = arith.constant 0 : index
    %158 = vector.load %arg10[%157, %c0_105, %c0_106] : memref<4x8x128xf32, #tpu.memory_space<vmem>>, vector<1x8x128xf32>
    %159 = vector.shape_cast %158 : vector<1x8x128xf32> to vector<8x128xf32>
    %160 = vector.shape_cast %156 : vector<8x128xf32> to vector<1x8x128xf32>
    tpu.vector_store %arg10[%157, %c0_105, %c0_106], %160 {strides = array<i32>} : memref<4x8x128xf32, #tpu.memory_space<vmem>>, vector<1x8x128xf32>,
    %c3_i32 = arith.constant 3 : i32
    %161 = arith.index_cast %c3_i32 : i32 to index
    %c0_107 = arith.constant 0 : index
    %c0_108 = arith.constant 0 : index
    %162 = vector.load %arg11[%161, %c0_107, %c0_108] : memref<4x8x512xf32, #tpu.memory_space<vmem>>, vector<1x8x512xf32>
    %163 = vector.shape_cast %162 : vector<1x8x512xf32> to vector<8x512xf32>
    %164 = arith.truncf %156 : vector<8x128xf32> to vector<8x128xbf16>
    %cst_109 = arith.constant dense<0.000000e+00> : vector<8x512xf32>
    %165 = tpu.matmul %164, %72, %cst_109 {dimension_numbers = #tpu.dot_dimension_numbers<[1], [0], [0], [1], [0, 0, 1, 1], [], []>} : vector<8x128xbf16>, vector<128x512xbf16>, vector<8x512xf32> -> vector<8x512xf32>
    %166 = arith.addf %163, %165 : vector<8x512xf32>
    %167 = vector.extract_strided_slice %166 {offsets = [0, 0], sizes = [8, 384], strides = [1, 1]} : vector<8x512xf32> to vector<8x384xf32>
    %168 = arith.negf %167 : vector<8x384xf32>
    %169 = math.exp %168 : vector<8x384xf32>
    %cst_110 = arith.constant 1.000000e+00 : f32
    %170 = vector.broadcast %cst_110 : f32 to vector<8x384xf32>
    %171 = arith.addf %170, %169 : vector<8x384xf32>
    %172 = arith.divf %170, %171 : vector<8x384xf32>
    %173 = vector.extract_strided_slice %166 {offsets = [0, 384], sizes = [8, 128], strides = [1, 1]} : vector<8x512xf32> to vector<8x128xf32>
    %174 = math.tanh %173 : vector<8x128xf32>
    %175 = vector.extract_strided_slice %172 {offsets = [0, 0], sizes = [8, 128], strides = [1, 1]} : vector<8x384xf32> to vector<8x128xf32>
    %176 = vector.extract_strided_slice %172 {offsets = [0, 128], sizes = [8, 128], strides = [1, 1]} : vector<8x384xf32> to vector<8x128xf32>
    %177 = vector.extract_strided_slice %172 {offsets = [0, 256], sizes = [8, 128], strides = [1, 1]} : vector<8x384xf32> to vector<8x128xf32>
    %178 = arith.mulf %176, %154 : vector<8x128xf32>
    %179 = arith.mulf %175, %174 : vector<8x128xf32>
    %180 = arith.addf %178, %179 : vector<8x128xf32>
    %181 = math.tanh %180 : vector<8x128xf32>
    %182 = arith.mulf %177, %181 : vector<8x128xf32>
    %183 = arith.index_cast %c3_i32 : i32 to index
    %c0_111 = arith.constant 0 : index
    %c0_112 = arith.constant 0 : index
    %184 = vector.load %arg10[%183, %c0_111, %c0_112] : memref<4x8x128xf32, #tpu.memory_space<vmem>>, vector<1x8x128xf32>
    %185 = vector.shape_cast %184 : vector<1x8x128xf32> to vector<8x128xf32>
    %186 = vector.shape_cast %182 : vector<8x128xf32> to vector<1x8x128xf32>
    tpu.vector_store %arg10[%183, %c0_111, %c0_112], %186 {strides = array<i32>} : memref<4x8x128xf32, #tpu.memory_space<vmem>>, vector<1x8x128xf32>,
    %c4_i32 = arith.constant 4 : i32
    %c1_i32_113 = arith.constant 1 : i32
    %c1_i32_114 = arith.constant 1 : i32
    %c0_i32_115 = arith.constant 0 : i32
    %c1_i32_116 = arith.constant 1 : i32
    %c0_i32_117 = arith.constant 0 : i32
    %c0_i32_118 = arith.constant 0 : i32
    %187 = tpu.memref_slice %arg4[%c1_i32_113, %c0_i32_117, %c0_i32_118] : memref<2x128x512xbf16, #tpu.memory_space<any>> -> memref<1x128x512xbf16, #tpu.memory_space<any>>
    %188 = tpu.memref_squeeze %187 : memref<1x128x512xbf16, #tpu.memory_space<any>> -> memref<128x512xbf16, #tpu.memory_space<any>>
    %c0_i32_119 = arith.constant 0 : i32
    %c0_i32_120 = arith.constant 0 : i32
    %189 = tpu.memref_slice %arg12[%c1_i32_114, %c0_i32_119, %c0_i32_120] : memref<2x128x512xbf16, #tpu.memory_space<vmem>> -> memref<1x128x512xbf16, #tpu.memory_space<vmem>>
    %190 = tpu.memref_squeeze %189 : memref<1x128x512xbf16, #tpu.memory_space<vmem>> -> memref<128x512xbf16, #tpu.memory_space<vmem>>
    %191 = tpu.memref_slice %arg14[%c0_i32_115, %c1_i32_116] : memref<2x2x!tpu.dma_semaphore, #tpu.memory_space<semaphore_mem>> -> memref<1x1x!tpu.dma_semaphore, #tpu.memory_space<semaphore_mem>>
    %192 = tpu.memref_squeeze %191 : memref<1x1x!tpu.dma_semaphore, #tpu.memory_space<semaphore_mem>> -> memref<!tpu.dma_semaphore, #tpu.memory_space<semaphore_mem>>
    tpu.wait_dma2 semaphore(%192 : memref<!tpu.dma_semaphore, #tpu.memory_space<semaphore_mem>>) src(%188 : memref<128x512xbf16, #tpu.memory_space<any>>) dst(%190 : memref<128x512xbf16, #tpu.memory_space<vmem>>)
    %c1_i32_121 = arith.constant 1 : i32
    %c1_i32_122 = arith.constant 1 : i32
    %c1_i32_123 = arith.constant 1 : i32
    %c1_i32_124 = arith.constant 1 : i32
    %c0_i32_125 = arith.constant 0 : i32
    %c0_i32_126 = arith.constant 0 : i32
    %193 = tpu.memref_slice %arg5[%c1_i32_121, %c0_i32_125, %c0_i32_126] : memref<2x128x512xbf16, #tpu.memory_space<any>> -> memref<1x128x512xbf16, #tpu.memory_space<any>>
    %194 = tpu.memref_squeeze %193 : memref<1x128x512xbf16, #tpu.memory_space<any>> -> memref<128x512xbf16, #tpu.memory_space<any>>
    %c0_i32_127 = arith.constant 0 : i32
    %c0_i32_128 = arith.constant 0 : i32
    %195 = tpu.memref_slice %arg13[%c1_i32_122, %c0_i32_127, %c0_i32_128] : memref<2x128x512xbf16, #tpu.memory_space<vmem>> -> memref<1x128x512xbf16, #tpu.memory_space<vmem>>
    %196 = tpu.memref_squeeze %195 : memref<1x128x512xbf16, #tpu.memory_space<vmem>> -> memref<128x512xbf16, #tpu.memory_space<vmem>>
    %197 = tpu.memref_slice %arg14[%c1_i32_123, %c1_i32_124] : memref<2x2x!tpu.dma_semaphore, #tpu.memory_space<semaphore_mem>> -> memref<1x1x!tpu.dma_semaphore, #tpu.memory_space<semaphore_mem>>
    %198 = tpu.memref_squeeze %197 : memref<1x1x!tpu.dma_semaphore, #tpu.memory_space<semaphore_mem>> -> memref<!tpu.dma_semaphore, #tpu.memory_space<semaphore_mem>>
    tpu.wait_dma2 semaphore(%198 : memref<!tpu.dma_semaphore, #tpu.memory_space<semaphore_mem>>) src(%194 : memref<128x512xbf16, #tpu.memory_space<any>>) dst(%196 : memref<128x512xbf16, #tpu.memory_space<vmem>>)
    %c1_129 = arith.constant 1 : index
    %c0_130 = arith.constant 0 : index
    %c0_131 = arith.constant 0 : index
    %199 = vector.load %arg12[%c1_129, %c0_130, %c0_131] : memref<2x128x512xbf16, #tpu.memory_space<vmem>>, vector<1x128x512xbf16>
    %200 = vector.shape_cast %199 : vector<1x128x512xbf16> to vector<128x512xbf16>
    %c1_132 = arith.constant 1 : index
    %c0_133 = arith.constant 0 : index
    %c0_134 = arith.constant 0 : index
    %201 = vector.load %arg13[%c1_132, %c0_133, %c0_134] : memref<2x128x512xbf16, #tpu.memory_space<vmem>>, vector<1x128x512xbf16>
    %202 = vector.shape_cast %201 : vector<1x128x512xbf16> to vector<128x512xbf16>
    %c1_135 = arith.constant 1 : index
    %c0_136 = arith.constant 0 : index
    %c0_137 = arith.constant 0 : index
    %203 = vector.load %arg6[%c1_135, %c0_136, %c0_137] : memref<2x1x512xf32, #tpu.memory_space<vmem>>, vector<1x1x512xf32>
    %204 = vector.shape_cast %203 : vector<1x1x512xf32> to vector<1x512xf32>
    %c0_138 = arith.constant 0 : index
    %c0_139 = arith.constant 0 : index
    %c0_140 = arith.constant 0 : index
    %205 = vector.load %arg10[%c0_138, %c0_139, %c0_140] : memref<4x8x128xf32, #tpu.memory_space<vmem>>, vector<4x8x128xf32>
    %206 = vector.shape_cast %205 : vector<4x8x128xf32> to vector<32x128xf32>
    %207 = arith.truncf %206 : vector<32x128xf32> to vector<32x128xbf16>
    %cst_141 = arith.constant dense<0.000000e+00> : vector<32x512xf32>
    %208 = tpu.matmul %207, %200, %cst_141 {dimension_numbers = #tpu.dot_dimension_numbers<[1], [0], [0], [1], [0, 0, 1, 1], [], []>} : vector<32x128xbf16>, vector<128x512xbf16>, vector<32x512xf32> -> vector<32x512xf32>
    %209 = vector.broadcast %204 : vector<1x512xf32> to vector<32x512xf32>
    %210 = arith.addf %208, %209 : vector<32x512xf32>
    %211 = vector.shape_cast %210 : vector<32x512xf32> to vector<4x8x512xf32>
    %c0_142 = arith.constant 0 : index
    %c0_143 = arith.constant 0 : index
    %c0_144 = arith.constant 0 : index
    %212 = vector.load %arg11[%c0_142, %c0_143, %c0_144] : memref<4x8x512xf32, #tpu.memory_space<vmem>>, vector<4x8x512xf32>
    tpu.vector_store %arg11[%c0_142, %c0_143, %c0_144], %211 {strides = array<i32>} : memref<4x8x512xf32, #tpu.memory_space<vmem>>, vector<4x8x512xf32>,
    %c0_i32_145 = arith.constant 0 : i32
    %213 = arith.index_cast %c0_i32_145 : i32 to index
    %c0_146 = arith.constant 0 : index
    %c0_147 = arith.constant 0 : index
    %214 = vector.load %arg11[%213, %c0_146, %c0_147] : memref<4x8x512xf32, #tpu.memory_space<vmem>>, vector<1x8x512xf32>
    %215 = vector.shape_cast %214 : vector<1x8x512xf32> to vector<8x512xf32>
    %216 = arith.truncf %44 : vector<8x128xf32> to vector<8x128xbf16>
    %cst_148 = arith.constant dense<0.000000e+00> : vector<8x512xf32>
    %217 = tpu.matmul %216, %202, %cst_148 {dimension_numbers = #tpu.dot_dimension_numbers<[1], [0], [0], [1], [0, 0, 1, 1], [], []>} : vector<8x128xbf16>, vector<128x512xbf16>, vector<8x512xf32> -> vector<8x512xf32>
    %218 = arith.addf %215, %217 : vector<8x512xf32>
    %219 = vector.extract_strided_slice %218 {offsets = [0, 0], sizes = [8, 384], strides = [1, 1]} : vector<8x512xf32> to vector<8x384xf32>
    %220 = arith.negf %219 : vector<8x384xf32>
    %221 = math.exp %220 : vector<8x384xf32>
    %cst_149 = arith.constant 1.000000e+00 : f32
    %222 = vector.broadcast %cst_149 : f32 to vector<8x384xf32>
    %223 = arith.addf %222, %221 : vector<8x384xf32>
    %224 = arith.divf %222, %223 : vector<8x384xf32>
    %225 = vector.extract_strided_slice %218 {offsets = [0, 384], sizes = [8, 128], strides = [1, 1]} : vector<8x512xf32> to vector<8x128xf32>
    %226 = math.tanh %225 : vector<8x128xf32>
    %227 = vector.extract_strided_slice %224 {offsets = [0, 0], sizes = [8, 128], strides = [1, 1]} : vector<8x384xf32> to vector<8x128xf32>
    %228 = vector.extract_strided_slice %224 {offsets = [0, 128], sizes = [8, 128], strides = [1, 1]} : vector<8x384xf32> to vector<8x128xf32>
    %229 = vector.extract_strided_slice %224 {offsets = [0, 256], sizes = [8, 128], strides = [1, 1]} : vector<8x384xf32> to vector<8x128xf32>
    %230 = arith.mulf %228, %44 : vector<8x128xf32>
    %231 = arith.mulf %227, %226 : vector<8x128xf32>
    %232 = arith.addf %230, %231 : vector<8x128xf32>
    %233 = math.tanh %232 : vector<8x128xf32>
    %234 = arith.mulf %229, %233 : vector<8x128xf32>
    %235 = arith.index_cast %c0_i32_145 : i32 to index
    %c0_150 = arith.constant 0 : index
    %c0_151 = arith.constant 0 : index
    %236 = vector.load %arg10[%235, %c0_150, %c0_151] : memref<4x8x128xf32, #tpu.memory_space<vmem>>, vector<1x8x128xf32>
    %237 = vector.shape_cast %236 : vector<1x8x128xf32> to vector<8x128xf32>
    %238 = vector.shape_cast %234 : vector<8x128xf32> to vector<1x8x128xf32>
    tpu.vector_store %arg10[%235, %c0_150, %c0_151], %238 {strides = array<i32>} : memref<4x8x128xf32, #tpu.memory_space<vmem>>, vector<1x8x128xf32>,
    %c1_i32_152 = arith.constant 1 : i32
    %239 = arith.index_cast %c1_i32_152 : i32 to index
    %c0_153 = arith.constant 0 : index
    %c0_154 = arith.constant 0 : index
    %240 = vector.load %arg11[%239, %c0_153, %c0_154] : memref<4x8x512xf32, #tpu.memory_space<vmem>>, vector<1x8x512xf32>
    %241 = vector.shape_cast %240 : vector<1x8x512xf32> to vector<8x512xf32>
    %242 = arith.truncf %234 : vector<8x128xf32> to vector<8x128xbf16>
    %cst_155 = arith.constant dense<0.000000e+00> : vector<8x512xf32>
    %243 = tpu.matmul %242, %202, %cst_155 {dimension_numbers = #tpu.dot_dimension_numbers<[1], [0], [0], [1], [0, 0, 1, 1], [], []>} : vector<8x128xbf16>, vector<128x512xbf16>, vector<8x512xf32> -> vector<8x512xf32>
    %244 = arith.addf %241, %243 : vector<8x512xf32>
    %245 = vector.extract_strided_slice %244 {offsets = [0, 0], sizes = [8, 384], strides = [1, 1]} : vector<8x512xf32> to vector<8x384xf32>
    %246 = arith.negf %245 : vector<8x384xf32>
    %247 = math.exp %246 : vector<8x384xf32>
    %cst_156 = arith.constant 1.000000e+00 : f32
    %248 = vector.broadcast %cst_156 : f32 to vector<8x384xf32>
    %249 = arith.addf %248, %247 : vector<8x384xf32>
    %250 = arith.divf %248, %249 : vector<8x384xf32>
    %251 = vector.extract_strided_slice %244 {offsets = [0, 384], sizes = [8, 128], strides = [1, 1]} : vector<8x512xf32> to vector<8x128xf32>
    %252 = math.tanh %251 : vector<8x128xf32>
    %253 = vector.extract_strided_slice %250 {offsets = [0, 0], sizes = [8, 128], strides = [1, 1]} : vector<8x384xf32> to vector<8x128xf32>
    %254 = vector.extract_strided_slice %250 {offsets = [0, 128], sizes = [8, 128], strides = [1, 1]} : vector<8x384xf32> to vector<8x128xf32>
    %255 = vector.extract_strided_slice %250 {offsets = [0, 256], sizes = [8, 128], strides = [1, 1]} : vector<8x384xf32> to vector<8x128xf32>
    %256 = arith.mulf %254, %232 : vector<8x128xf32>
    %257 = arith.mulf %253, %252 : vector<8x128xf32>
    %258 = arith.addf %256, %257 : vector<8x128xf32>
    %259 = math.tanh %258 : vector<8x128xf32>
    %260 = arith.mulf %255, %259 : vector<8x128xf32>
    %261 = arith.index_cast %c1_i32_152 : i32 to index
    %c0_157 = arith.constant 0 : index
    %c0_158 = arith.constant 0 : index
    %262 = vector.load %arg10[%261, %c0_157, %c0_158] : memref<4x8x128xf32, #tpu.memory_space<vmem>>, vector<1x8x128xf32>
    %263 = vector.shape_cast %262 : vector<1x8x128xf32> to vector<8x128xf32>
    %264 = vector.shape_cast %260 : vector<8x128xf32> to vector<1x8x128xf32>
    tpu.vector_store %arg10[%261, %c0_157, %c0_158], %264 {strides = array<i32>} : memref<4x8x128xf32, #tpu.memory_space<vmem>>, vector<1x8x128xf32>,
    %c2_i32_159 = arith.constant 2 : i32
    %265 = arith.index_cast %c2_i32_159 : i32 to index
    %c0_160 = arith.constant 0 : index
    %c0_161 = arith.constant 0 : index
    %266 = vector.load %arg11[%265, %c0_160, %c0_161] : memref<4x8x512xf32, #tpu.memory_space<vmem>>, vector<1x8x512xf32>
    %267 = vector.shape_cast %266 : vector<1x8x512xf32> to vector<8x512xf32>
    %268 = arith.truncf %260 : vector<8x128xf32> to vector<8x128xbf16>
    %cst_162 = arith.constant dense<0.000000e+00> : vector<8x512xf32>
    %269 = tpu.matmul %268, %202, %cst_162 {dimension_numbers = #tpu.dot_dimension_numbers<[1], [0], [0], [1], [0, 0, 1, 1], [], []>} : vector<8x128xbf16>, vector<128x512xbf16>, vector<8x512xf32> -> vector<8x512xf32>
    %270 = arith.addf %267, %269 : vector<8x512xf32>
    %271 = vector.extract_strided_slice %270 {offsets = [0, 0], sizes = [8, 384], strides = [1, 1]} : vector<8x512xf32> to vector<8x384xf32>
    %272 = arith.negf %271 : vector<8x384xf32>
    %273 = math.exp %272 : vector<8x384xf32>
    %cst_163 = arith.constant 1.000000e+00 : f32
    %274 = vector.broadcast %cst_163 : f32 to vector<8x384xf32>
    %275 = arith.addf %274, %273 : vector<8x384xf32>
    %276 = arith.divf %274, %275 : vector<8x384xf32>
    %277 = vector.extract_strided_slice %270 {offsets = [0, 384], sizes = [8, 128], strides = [1, 1]} : vector<8x512xf32> to vector<8x128xf32>
    %278 = math.tanh %277 : vector<8x128xf32>
    %279 = vector.extract_strided_slice %276 {offsets = [0, 0], sizes = [8, 128], strides = [1, 1]} : vector<8x384xf32> to vector<8x128xf32>
    %280 = vector.extract_strided_slice %276 {offsets = [0, 128], sizes = [8, 128], strides = [1, 1]} : vector<8x384xf32> to vector<8x128xf32>
    %281 = vector.extract_strided_slice %276 {offsets = [0, 256], sizes = [8, 128], strides = [1, 1]} : vector<8x384xf32> to vector<8x128xf32>
    %282 = arith.mulf %280, %258 : vector<8x128xf32>
    %283 = arith.mulf %279, %278 : vector<8x128xf32>
    %284 = arith.addf %282, %283 : vector<8x128xf32>
    %285 = math.tanh %284 : vector<8x128xf32>
    %286 = arith.mulf %281, %285 : vector<8x128xf32>
    %287 = arith.index_cast %c2_i32_159 : i32 to index
    %c0_164 = arith.constant 0 : index
    %c0_165 = arith.constant 0 : index
    %288 = vector.load %arg10[%287, %c0_164, %c0_165] : memref<4x8x128xf32, #tpu.memory_space<vmem>>, vector<1x8x128xf32>
    %289 = vector.shape_cast %288 : vector<1x8x128xf32> to vector<8x128xf32>
    %290 = vector.shape_cast %286 : vector<8x128xf32> to vector<1x8x128xf32>
    tpu.vector_store %arg10[%287, %c0_164, %c0_165], %290 {strides = array<i32>} : memref<4x8x128xf32, #tpu.memory_space<vmem>>, vector<1x8x128xf32>,
    %c3_i32_166 = arith.constant 3 : i32
    %291 = arith.index_cast %c3_i32_166 : i32 to index
    %c0_167 = arith.constant 0 : index
    %c0_168 = arith.constant 0 : index
    %292 = vector.load %arg11[%291, %c0_167, %c0_168] : memref<4x8x512xf32, #tpu.memory_space<vmem>>, vector<1x8x512xf32>
    %293 = vector.shape_cast %292 : vector<1x8x512xf32> to vector<8x512xf32>
    %294 = arith.truncf %286 : vector<8x128xf32> to vector<8x128xbf16>
    %cst_169 = arith.constant dense<0.000000e+00> : vector<8x512xf32>
    %295 = tpu.matmul %294, %202, %cst_169 {dimension_numbers = #tpu.dot_dimension_numbers<[1], [0], [0], [1], [0, 0, 1, 1], [], []>} : vector<8x128xbf16>, vector<128x512xbf16>, vector<8x512xf32> -> vector<8x512xf32>
    %296 = arith.addf %293, %295 : vector<8x512xf32>
    %297 = vector.extract_strided_slice %296 {offsets = [0, 0], sizes = [8, 384], strides = [1, 1]} : vector<8x512xf32> to vector<8x384xf32>
    %298 = arith.negf %297 : vector<8x384xf32>
    %299 = math.exp %298 : vector<8x384xf32>
    %cst_170 = arith.constant 1.000000e+00 : f32
    %300 = vector.broadcast %cst_170 : f32 to vector<8x384xf32>
    %301 = arith.addf %300, %299 : vector<8x384xf32>
    %302 = arith.divf %300, %301 : vector<8x384xf32>
    %303 = vector.extract_strided_slice %296 {offsets = [0, 384], sizes = [8, 128], strides = [1, 1]} : vector<8x512xf32> to vector<8x128xf32>
    %304 = math.tanh %303 : vector<8x128xf32>
    %305 = vector.extract_strided_slice %302 {offsets = [0, 0], sizes = [8, 128], strides = [1, 1]} : vector<8x384xf32> to vector<8x128xf32>
    %306 = vector.extract_strided_slice %302 {offsets = [0, 128], sizes = [8, 128], strides = [1, 1]} : vector<8x384xf32> to vector<8x128xf32>
    %307 = vector.extract_strided_slice %302 {offsets = [0, 256], sizes = [8, 128], strides = [1, 1]} : vector<8x384xf32> to vector<8x128xf32>
    %308 = arith.mulf %306, %284 : vector<8x128xf32>
    %309 = arith.mulf %305, %304 : vector<8x128xf32>
    %310 = arith.addf %308, %309 : vector<8x128xf32>
    %311 = math.tanh %310 : vector<8x128xf32>
    %312 = arith.mulf %307, %311 : vector<8x128xf32>
    %313 = arith.index_cast %c3_i32_166 : i32 to index
    %c0_171 = arith.constant 0 : index
    %c0_172 = arith.constant 0 : index
    %314 = vector.load %arg10[%313, %c0_171, %c0_172] : memref<4x8x128xf32, #tpu.memory_space<vmem>>, vector<1x8x128xf32>
    %315 = vector.shape_cast %314 : vector<1x8x128xf32> to vector<8x128xf32>
    %316 = vector.shape_cast %312 : vector<8x128xf32> to vector<1x8x128xf32>
    tpu.vector_store %arg10[%313, %c0_171, %c0_172], %316 {strides = array<i32>} : memref<4x8x128xf32, #tpu.memory_space<vmem>>, vector<1x8x128xf32>,
    %c4_i32_173 = arith.constant 4 : i32
    %317 = arith.truncf %312 : vector<8x128xf32> to vector<8x128xbf16>
    %c0_174 = arith.constant 0 : index
    %c0_175 = arith.constant 0 : index
    %318 = vector.load %arg7[%c0_174, %c0_175] : memref<128x8xbf16, #tpu.memory_space<vmem>>, vector<128x8xbf16>
    %cst_176 = arith.constant dense<0.000000e+00> : vector<8x8xf32>
    %319 = tpu.matmul %317, %318, %cst_176 {dimension_numbers = #tpu.dot_dimension_numbers<[1], [0], [0], [1], [0, 0, 1, 1], [], []>} : vector<8x128xbf16>, vector<128x8xbf16>, vector<8x8xf32> -> vector<8x8xf32>
    %c0_177 = arith.constant 0 : index
    %c0_178 = arith.constant 0 : index
    %320 = vector.load %arg8[%c0_177, %c0_178] : memref<1x8xf32, #tpu.memory_space<vmem>>, vector<1x8xf32>
    %321 = vector.broadcast %320 : vector<1x8xf32> to vector<8x8xf32>
    %322 = arith.addf %319, %321 : vector<8x8xf32>
    %c0_179 = arith.constant 0 : index
    %c0_180 = arith.constant 0 : index
    %323 = vector.load %arg9[%c0_179, %c0_180] : memref<8x8xf32, #tpu.memory_space<vmem>>, vector<8x8xf32>
    tpu.vector_store %arg9[%c0_179, %c0_180], %322 {strides = array<i32>} : memref<8x8xf32, #tpu.memory_space<vmem>>, vector<8x8xf32>,
    return
  }
  func.func @transform_0(%arg0: i32) -> (i32, i32, i32) {
    %c0_i32 = arith.constant 0 : i32
    %c0_i32_0 = arith.constant 0 : i32
    %c0_i32_1 = arith.constant 0 : i32
    return %c0_i32, %arg0, %c0_i32_0 : i32, i32, i32
  }
  func.func @transform_1(%arg0: i32) -> (i32, i32, i32) {
    %c0_i32 = arith.constant 0 : i32
    %c0_i32_0 = arith.constant 0 : i32
    %c0_i32_1 = arith.constant 0 : i32
    %c0_i32_2 = arith.constant 0 : i32
    return %c0_i32, %c0_i32_0, %c0_i32_1 : i32, i32, i32
  }
  func.func @transform_2(%arg0: i32) -> (i32, i32) {
    %c0_i32 = arith.constant 0 : i32
    %c0_i32_0 = arith.constant 0 : i32
    %c0_i32_1 = arith.constant 0 : i32
    return %c0_i32, %c0_i32_0 : i32, i32
  }
  func.func @transform_5(%arg0: i32) -> (i32, i32, i32) {
    %c0_i32 = arith.constant 0 : i32
    %c0_i32_0 = arith.constant 0 : i32
    %c0_i32_1 = arith.constant 0 : i32
    %c0_i32_2 = arith.constant 0 : i32
    return %c0_i32, %c0_i32_0, %c0_i32_1 : i32, i32, i32
  }
  func.func @transform_6(%arg0: i32) -> (i32, i32) {
    %c0_i32 = arith.constant 0 : i32
    %c0_i32_0 = arith.constant 0 : i32
    %c0_i32_1 = arith.constant 0 : i32
    return %c0_i32, %c0_i32_0 : i32, i32
  }
  func.func @transform_7(%arg0: i32) -> (i32, i32) {
    %c0_i32 = arith.constant 0 : i32
    %c0_i32_0 = arith.constant 0 : i32
    %c0_i32_1 = arith.constant 0 : i32
    return %c0_i32, %c0_i32_0 : i32, i32
  }
  func.func @transform_8(%arg0: i32) -> (i32, i32) {
    %c0_i32 = arith.constant 0 : i32
    %c0_i32_0 = arith.constant 0 : i32
    return %arg0, %c0_i32 : i32, i32
  }
}

</mosaic_0001>

<bundles_post_ra>
// kernel: tpu_custom_call.1
= control target key start
LH: loop header
LB: loop body
LE: loop exit
PB: predicated region body
PF: predicated region fallthrough
CT: control target
= control target key end

     0   :  { %vm91_vm0 = vcmask 1041408   ;;  %vm78_vm1 = vcmask 31744   ;;  %s4037_s0 = inlined_call_operand.vmem [shape: f32[10,8,4], index: 0, kind: input, shape index: {}]   ;;  %s4038_s1 = inlined_call_operand.vmem [shape: bf16[3,4,128], index: 1, kind: input, shape index: {}]   ;;  %s4039_s2 = inlined_call_operand.vmem [shape: f32[1,128], index: 2, kind: input, shape index: {}]   ;;  %s4040_s3 = inlined_call_operand.hbm [shape: bf16[2,128,512], index: 3, kind: input, shape index: {}]   ;;  %s4041_s4 = inlined_call_operand.hbm [shape: bf16[2,128,512], index: 4, kind: input, shape index: {}]   ;;  %s4042_s5 = inlined_call_operand.vmem [shape: f32[2,1,512], index: 5, kind: input, shape index: {}]   ;;  %s4043_s6 = inlined_call_operand.vmem [shape: bf16[128,8], index: 6, kind: input, shape index: {}]   ;;  %s4044_s7 = inlined_call_operand.vmem [shape: f32[1,8], index: 7, kind: input, shape index: {}]   ;;  %s4045_s8 = inlined_call_operand.hbm [shape: f32[8,8], index: 8, kind: output, shape index: {}]  }
   0x1   :  { %v2576_v0 = vld [vmem:[%s4038_s1 + $0x2] sm:$0x3]  ;;  %v62_v1 = vld [vmem:[%s4038_s1] sm:$0x3]  ;;  %v2568_v2 = vld [vmem:[%s4037_s0 + $0x8] sm:$0xff] }
   0x2   :  { %2839 = vmatprep.subr.msk.bf16.mxu0 %vm91_vm0, %v2576_v0  ;;  %2840 = vmatprep.subr.msk.bf16.mxu1 %vm91_vm0, %v62_v1  ;;  %v93_v3 = vsel %vm91_vm0, %v2576_v0, 0  ;;  %v173_v4 = vsel %vm91_vm0, %v62_v1, 0  ;;  %v2569_v5 = vld [vmem:[%s4037_s0 + $0x10] sm:$0xff]  ;;  %v50_v6 = vld [vmem:[%s4037_s0] sm:$0xff]  ;;  %v2570_v7 = vld [vmem:[%s4037_s0 + $0x18] sm:$0xff] }
   0x3   :  { %2790 = vmatpush3.bf16.msra.mxu0 %v93_v3  ;;  %2800 = vmatpush3.bf16.msra.mxu1 %v173_v4  ;;  %v72_v8 = vpack.c.bf16 %v2569_v5, %v2568_v2  ;;  %v58_v9 = vpack.c.bf16 %v2568_v2, %v50_v6  ;;  %v2571_v10 = vld [vmem:[%s4037_s0 + $0x20] sm:$0xff]  ;;  %v59_v11 = vpack.c.bf16 %v2570_v7, %v2569_v5  ;;  %v2572_v13 = vld [vmem:[%s4037_s0 + $0x28] sm:$0xff]  ;;  %v2573_v16 = vld [vmem:[%s4037_s0 + $0x30] sm:$0xff] }
   0x4   :  { %v2593_v12 = vld [vmem:[%s4038_s1 + $0x4] sm:$0x3]  ;;  %v73_v14 = vpack.c.bf16 %v2571_v10, %v2570_v7  ;;  %v60_v17 = vpack.c.bf16 %v2572_v13, %v2571_v10  ;;  %v74_v18 = vpack.c.bf16 %v2573_v16, %v2572_v13 }
   0x5   :  { %2841 = vmatprep.subr.msk.bf16.mxu0 %vm91_vm0, %v2593_v12  ;;  %v268_v15 = vsel %vm91_vm0, %v2593_v12, 0  ;;  %2791 = vmatprep.mubr.msk.bf16.mxu0 %vm78_vm1, %v72_v8 }
   0x6   :  { %2801 = vmatprep.mubr.msk.bf16.mxu1 %vm78_vm1, %v58_v9 }
   0x7   :  { %13 = vsyncpa [#allocation8], 0  ;;  %2792 = vmatmul.mubr.msk.bf16.vlgmr.msra.gmra.mxu0 %vm78_vm1, %v73_v14  ;;  %2802 = vmatmul.mubr.msk.bf16.vlgmr.msra.gmra.mxu1 %vm78_vm1, %v59_v11  ;;  %v2574_v19 = vld [vmem:[%s4037_s0 + $0x38] sm:$0xff]  ;;  %v2575_v20 = vld [vmem:[%s4037_s0 + $0x40] sm:$0xff]  ;;  %s3294_s30 = smov [#allocation4]   ;;  %s3295_s10 = smov [#allocation5]  }
   0x8   :  { %2810 = vmatpush3.bf16.msra.mxu0 %v268_v15  ;;  %2795 = vmatprep.mubr.msk.bf16.mxu0 %vm78_vm1, %v74_v18  ;;  %v75_v21 = vpack.c.bf16 %v2575_v20, %v2574_v19  ;;  %v61_v22 = vpack.c.bf16 %v2574_v19, %v2573_v16  ;;  %v2592_v23 = vld [vmem:[%s4037_s0 + $0x48] sm:$0xff]  ;;  %s34_s9 = sshll.u32 %s3294_s30, 4  ;;  %s46_s11 = sshll.u32 %s3295_s10, 4  ;;  %s3404_s9 = int_to_ptr.vmem [resolvable:$true] %s34_s9  ;;  %s3417_s11 = int_to_ptr.vmem [resolvable:$true] %s46_s11 }
   0x9   :  { %2805 = vmatprep.mubr.msk.bf16.mxu1 %vm78_vm1, %v60_v17  ;;  %v252_v24 = vpack.c.bf16 %v2592_v23, %v2575_v20  ;;  %s3186_s12 = scalar_lea.vmem %s3404_s9, 4096  ;;  %s3190_s13 = scalar_lea.vmem %s3404_s9, 8192 }
   0xa   :  { %p3187_p0 = scmp.ne.s32.totalorder %s3404_s9, %s3186_s12  ;;  %p3191_p1 = scmp.lt.s32.totalorder %s3404_s9, %s3404_s9 }
   0xb   :  { %p3192_p2 = scmp.lt.s32.totalorder %s3190_s13, %s3186_s12 }
   0xd   :  { %p3193_p3 = por %p3192_p2, %p3191_p1 }
   0xf   :  { %2796 = vmatmul.mubr.msk.bf16.gmra.mxu0 %vm78_vm1, %v75_v21  ;;  %2806 = vmatmul.mubr.msk.bf16.gmra.mxu1 %vm78_vm1, %v61_v22  ;;  %p3194_p4 = pnand %p3193_p3, %p3187_p0 }
  0x10   :  { %2811 = vmatprep.mubr.msk.bf16.mxu0 %vm78_vm1, %v59_v11 }
  0x17   :  { %2812 = vmatmul.mubr.msk.bf16.vlgmr.msra.gmra.mxu0 %vm78_vm1, %v60_v17 }
  0x18   :  { %2815 = vmatprep.mubr.msk.bf16.mxu0 %vm78_vm1, %v61_v22 }
  0x1f   :  { %2816 = vmatmul.mubr.msk.bf16.gmra.mxu0 %vm78_vm1, %v252_v24 }
  0x20   :  { %3197 = shalt.err (!%p3194_p4)  }
  0x21   :  { %37 = dma.hbm_to_vmem [thread:$0]  %s4040_s3, 4096, %s3404_s9, [#allocation6] }
  0x22   :  { %s3206_s15 = scalar_lea.vmem %s3417_s11, 4096  ;;  %s3210_s16 = scalar_lea.vmem %s3417_s11, 8192 }
  0x23   :  { %p3207_p5 = scmp.ne.s32.totalorder %s3417_s11, %s3206_s15  ;;  %p3211_p6 = scmp.lt.s32.totalorder %s3417_s11, %s3417_s11 }
  0x24   :  { %p3212_p7 = scmp.lt.s32.totalorder %s3210_s16, %s3206_s15 }
  0x26   :  { %p3213_p8 = por %p3212_p7, %p3211_p6 }
  0x28   :  { %p3214_p9 = pnand %p3213_p8, %p3207_p5 }
  0x2a   :  { %3217 = shalt.err (!%p3214_p9)  }
  0x2b   :  { %49 = dma.hbm_to_vmem [thread:$0]  %s4041_s4, 4096, %s3417_s11, [#allocation6 + $0x2]  ;;  %v2598_v43 = vld [vmem:[%s4039_s2] ss:$0 sm:$0xff] }
  0xc7   :  { %v2793_v25 = vpop.f32.mrf.mxu0  ;;  %v2803_v26 = vpop.f32.mrf.mxu1 }
  0xc8   :  { %v218_v38 = vadd.f32 %v2803_v26, %v2793_v25 }
  0xc9   :  { %v129_v27 = vpop.f32.mrf.mxu0  ;;  %v209_v28 = vpop.f32.mrf.mxu1 }
  0xca   :  { %v210_v40 = vadd.f32 %v209_v28, %v129_v27 }
  0xcb   :  { %v2794_v29 = vpop.f32.mrf.mxu0  ;;  %v2804_v30 = vpop.f32.mrf.mxu1 }
  0xcc   :  { %v221_v45 = vadd.f32 %v2804_v30, %v2794_v29 }
  0xcd   :  { %v132_v31 = vpop.f32.mrf.mxu0  ;;  %v212_v33 = vpop.f32.mrf.mxu1 }
  0xce   :  { %v213_v48 = vadd.f32 %v212_v33, %v132_v31 }
  0xcf   :  { %v2797_v32 = vpop.f32.mrf.mxu0  ;;  %v2807_v36 = vpop.f32.mrf.mxu1 }
  0xd0   :  { %v234_v53 = vadd.f32 %v2807_v36, %v2797_v32 }
  0xd1   :  { %v145_v34 = vpop.f32.mrf.mxu0  ;;  %v225_v42 = vpop.f32.mrf.mxu1 }
  0xd2   :  { %v226_v57 = vadd.f32 %v225_v42, %v145_v34 }
  0xd3   :  { %v2798_v35 = vpop.f32.mrf.mxu0  ;;  %v2808_v51 = vpop.f32.mrf.mxu1 }
  0xd4   :  { %v237_v63 = vadd.f32 %v2808_v51, %v2798_v35 }
  0xd5   :  { %v148_v37 = vpop.f32.mrf.mxu0  ;;  %v228_v0 = vpop.f32.mrf.mxu1 }
  0xd6   :  { %v229_v7 = vadd.f32 %v228_v0, %v148_v37 }
  0xd7   :  { %v2813_v39 = vpop.f32.mrf.mxu0 }
  0xd8   :  { %v337_v41 = vadd.f32 %v2813_v39, %v218_v38 }
  0xd9   :  { %v304_v44 = vpop.f32.mrf.mxu0 }
  0xda   :  { %v335_v46 = vadd.f32 %v304_v44, %v210_v40  ;;  %v352_v49 = vadd.f32 %v2598_v43, %v337_v41 }
  0xdb   :  { %v2814_v47 = vpop.f32.mrf.mxu0 }
  0xdc   :  { %v338_v50 = vadd.f32 %v2814_v47, %v221_v45  ;;  %v350_v54 = vadd.f32 %v2598_v43, %v335_v46  ;;  %v360_v59 = vmax.f32 %v352_v49, 0.0 }
  0xdd   :  { %v307_v52 = vpop.f32.mrf.mxu0 }
  0xde   :  { %v353_v55 = vadd.f32 %v2598_v43, %v338_v50  ;;  %v336_v56 = vadd.f32 %v307_v52, %v213_v48  ;;  %v358_v2 = vmax.f32 %v350_v54, 0.0 }
  0xdf   :  { %v2817_v58 = vpop.f32.mrf.mxu0 }
  0xe0   :  { %v361_v60 = vmax.f32 %v353_v55, 0.0  ;;  %v351_v61 = vadd.f32 %v2598_v43, %v336_v56  ;;  %v341_v62 = vadd.f32 %v2817_v58, %v234_v53 }
  0xe1   :  { %v320_v1 = vpop.f32.mrf.mxu0 }
  0xe2   :  { %v3433_v3 = vmax.f32 %v360_v59, %v361_v60  ;;  %v359_v4 = vmax.f32 %v351_v61, 0.0  ;;  %v339_v5 = vadd.f32 %v320_v1, %v226_v57  ;;  %v356_v9 = vadd.f32 %v2598_v43, %v341_v62 }
  0xe3   :  { %v2818_v6 = vpop.f32.mrf.mxu0 }
  0xe4   :  { %v3435_v8 = vmax.f32 %v358_v2, %v359_v4  ;;  %v342_v10 = vadd.f32 %v2818_v6, %v237_v63  ;;  %v354_v12 = vadd.f32 %v2598_v43, %v339_v5  ;;  %v364_v15 = vmax.f32 %v356_v9, 0.0 }
  0xe5   :  { %v323_v11 = vpop.f32.mrf.mxu0 }
  0xe6   :  { %v357_v13 = vadd.f32 %v2598_v43, %v342_v10  ;;  %v340_v14 = vadd.f32 %v323_v11, %v229_v7  ;;  %v362_v18 = vmax.f32 %v354_v12, 0.0 }
  0xe8   :  { %v365_v16 = vmax.f32 %v357_v13, 0.0  ;;  %v355_v17 = vadd.f32 %v2598_v43, %v340_v14 }
  0xea   :  { %v3437_v19 = vmax.f32 %v364_v15, %v365_v16  ;;  %v363_v20 = vmax.f32 %v355_v17, 0.0 }
  0xec   :  { %v3439_v21 = vmax.f32 %v362_v18, %v363_v20 }
  0xed   :  { %3284 = dma.done.wait [#allocation6], 4096 }
  0xee   :  { %3285 = vsyncadd [#allocation6], 4294963200 }
  0xef   :  { %3286 = dma.done.wait [#allocation6 + $0x2], 4096 }
  0xf0   :  { %3287 = vsyncadd [#allocation6 + $0x2], 4294963200  ;;  %s380_s22 = scalar_lea.hbm %s4040_s3, 4096  ;;  %s3296_s23 = smov [#allocation4 + $0x100]   ;;  %v4050_v22 = vmov 0  }
  0xf1   :  { %s390_s24 = sshll.u32 %s3296_s23, 4  ;;  %s394_s26 = scalar_lea.hbm %s4041_s4, 4096  ;;  %692 = vmatprep.mubr.bf16.mxu1 %v4050_v22  ;;  %745 = vmatprep.mubr.bf16.mxu0 %v4050_v22  ;;  %s391_s24 = int_to_ptr.vmem [resolvable:$true] %s390_s24 }
  0xf2   :  { %s3228_s27 = scalar_lea.vmem %s391_s24, 4096  ;;  %p3233_p11 = scmp.lt.s32.totalorder %s391_s24, %s3404_s9 }
  0xf3   :  { %p3229_p10 = scmp.ne.s32.totalorder %s391_s24, %s3228_s27  ;;  %p3234_p12 = scmp.lt.s32.totalorder %s3190_s13, %s3228_s27 }
  0xf5   :  { %p3235_p13 = por %p3234_p12, %p3233_p11 }
  0xf7   :  { %p3236_p0 = pnand %p3235_p13, %p3229_p10 }
  0xf9   :  { %3239 = shalt.err (!%p3236_p0)  }
  0xfa   :  { %393 = dma.hbm_to_vmem [thread:$0]  %s380_s22, 4096, %s391_s24, [#allocation6 + $0x1] }
  0xfb   :  { %s3298_s3 = smov [#allocation5 + $0x100]  }
  0xfc   :  { %s404_s28 = sshll.u32 %s3298_s3, 4  ;;  %s405_s28 = int_to_ptr.vmem [resolvable:$true] %s404_s28 }
  0xfd   :  { %s3251_s4 = scalar_lea.vmem %s405_s28, 4096  ;;  %p3256_p2 = scmp.lt.s32.totalorder %s405_s28, %s3417_s11 }
  0xfe   :  { %p3252_p1 = scmp.ne.s32.totalorder %s405_s28, %s3251_s4  ;;  %p3257_p3 = scmp.lt.s32.totalorder %s3210_s16, %s3251_s4 }
 0x100   :  { %p3258_p4 = por %p3257_p3, %p3256_p2 }
 0x102   :  { %p3259_p5 = pnand %p3258_p4, %p3252_p1 }
 0x104   :  { %3262 = shalt.err (!%p3259_p5)  }
 0x105   :  { %407 = dma.hbm_to_vmem [thread:$0]  %s394_s26, 4096, %s405_s28, [#allocation6 + $0x3]  ;;  %v2850_v23 = vld [vmem:[#allocation4 + $0xe4] ss:$16 sps:$4 sm:$0xff]   ;;  %v2852_v24 = vld [vmem:[#allocation4 + $0xec] ss:$16 sps:$4 sm:$0xff]   ;;  %v477_v57 = vpack.c.bf16 %v3433_v3, %v3435_v8  ;;  %v478_v4 = vpack.c.bf16 %v3437_v19, %v3439_v21 }
 0x106   :  { %660 = vmatprep.subr.bf16.mxu1 %v2850_v23  ;;  %v2854_v25 = vld [vmem:[#allocation4 + $0xe0] ss:$16 sps:$4 sm:$0xff]   ;;  %v2855_v26 = vld [vmem:[#allocation4 + $0xe8] ss:$16 sps:$4 sm:$0xff]   ;;  %713 = vmatprep.subr.bf16.mxu0 %v2852_v24  ;;  %v2856_v27 = vld [vmem:[#allocation4 + $0xc4] ss:$16 sps:$4 sm:$0xff]  }
 0x107   :  { %661 = vmatpush1.bf16.msra.mxu1 %v2854_v25  ;;  %714 = vmatpush1.bf16.msra.mxu0 %v2855_v26  ;;  %v2858_v28 = vld [vmem:[#allocation4 + $0xcc] ss:$16 sps:$4 sm:$0xff]   ;;  %v2860_v29 = vld [vmem:[#allocation4 + $0xc0] ss:$16 sps:$4 sm:$0xff]   ;;  %v2861_v30 = vld [vmem:[#allocation4 + $0xc8] ss:$16 sps:$4 sm:$0xff]   ;;  %v480_v26 = vlaneseq }
 0x108   :  { %662 = vmatprep.subr.bf16.mxu1 %v2856_v27  ;;  %715 = vmatprep.subr.bf16.mxu0 %v2858_v28  ;;  %v2862_v31 = vld [vmem:[#allocation4 + $0xa4] ss:$16 sps:$4 sm:$0xff]   ;;  %v2864_v32 = vld [vmem:[#allocation4 + $0xac] ss:$16 sps:$4 sm:$0xff]   ;;  %v2866_v33 = vld [vmem:[#allocation4 + $0xa0] ss:$16 sps:$4 sm:$0xff]  }
 0x109   :  { %v2867_v34 = vld [vmem:[#allocation4 + $0xa8] ss:$16 sps:$4 sm:$0xff]   ;;  %v2868_v35 = vld [vmem:[#allocation4 + $0x84] ss:$16 sps:$4 sm:$0xff]   ;;  %v2870_v36 = vld [vmem:[#allocation4 + $0x8c] ss:$16 sps:$4 sm:$0xff]  }
 0x10a   :  { %v2872_v37 = vld [vmem:[#allocation4 + $0x80] ss:$16 sps:$4 sm:$0xff]   ;;  %v2873_v38 = vld [vmem:[#allocation4 + $0x88] ss:$16 sps:$4 sm:$0xff]   ;;  %v2874_v39 = vld [vmem:[#allocation4 + $0x64] ss:$16 sps:$4 sm:$0xff]  }
 0x10b   :  { %663 = vmatpush1.bf16.msra.mxu1 %v2860_v29  ;;  %716 = vmatpush1.bf16.msra.mxu0 %v2861_v30  ;;  %v2876_v40 = vld [vmem:[#allocation4 + $0x6c] ss:$16 sps:$4 sm:$0xff]   ;;  %v2878_v41 = vld [vmem:[#allocation4 + $0x60] ss:$16 sps:$4 sm:$0xff]   ;;  %v2879_v42 = vld [vmem:[#allocation4 + $0x68] ss:$16 sps:$4 sm:$0xff]  }
 0x10c   :  { %664 = vmatprep.subr.bf16.mxu1 %v2862_v31  ;;  %717 = vmatprep.subr.bf16.mxu0 %v2864_v32  ;;  %v2880_v43 = vld [vmem:[#allocation4 + $0x44] ss:$16 sps:$4 sm:$0xff]   ;;  %v2882_v44 = vld [vmem:[#allocation4 + $0x4c] ss:$16 sps:$4 sm:$0xff]   ;;  %v2884_v45 = vld [vmem:[#allocation4 + $0x40] ss:$16 sps:$4 sm:$0xff]  }
 0x10d   :  { %v2885_v46 = vld [vmem:[#allocation4 + $0x48] ss:$16 sps:$4 sm:$0xff]   ;;  %v2886_v47 = vld [vmem:[#allocation4 + $0x24] ss:$16 sps:$4 sm:$0xff]   ;;  %v2888_v48 = vld [vmem:[#allocation4 + $0x2c] ss:$16 sps:$4 sm:$0xff]  }
 0x10e   :  { %v2890_v49 = vld [vmem:[#allocation4 + $0x20] ss:$16 sps:$4 sm:$0xff]   ;;  %v2891_v50 = vld [vmem:[#allocation4 + $0x28] ss:$16 sps:$4 sm:$0xff]   ;;  %v2892_v51 = vld [vmem:[#allocation4 + $0x4] ss:$16 sps:$4 sm:$0xff]  }
 0x10f   :  { %665 = vmatpush1.bf16.msra.mxu1 %v2866_v33  ;;  %718 = vmatpush1.bf16.msra.mxu0 %v2867_v34  ;;  %v2894_v52 = vld [vmem:[#allocation4 + $0xc] ss:$16 sps:$4 sm:$0xff]   ;;  %v2896_v53 = vld [vmem:[#allocation4] ss:$16 sps:$4 sm:$0xff]   ;;  %v2897_v54 = vld [vmem:[#allocation4 + $0x8] ss:$16 sps:$4 sm:$0xff]  }
 0x110   :  { %666 = vmatprep.subr.bf16.mxu1 %v2868_v35  ;;  %719 = vmatprep.subr.bf16.mxu0 %v2870_v36  ;;  %v3455_v55 = vld [vmem:[#allocation5 + $0xe4] ss:$16 sps:$4 sm:$0xff]   ;;  %v3457_v56 = vld [vmem:[#allocation5 + $0xec] ss:$16 sps:$4 sm:$0xff]   ;;  %v3461_v58 = vld [vmem:[#allocation5 + $0xe0] ss:$16 sps:$4 sm:$0xff]  }
 0x111   :  { %v3463_v59 = vld [vmem:[#allocation5 + $0xe8] ss:$16 sps:$4 sm:$0xff]   ;;  %v3465_v60 = vld [vmem:[#allocation5 + $0xc4] ss:$16 sps:$4 sm:$0xff]   ;;  %v3469_v61 = vld [vmem:[#allocation5 + $0xcc] ss:$16 sps:$4 sm:$0xff]  }
 0x112   :  { %v3471_v62 = vld [vmem:[#allocation5 + $0xc0] ss:$16 sps:$4 sm:$0xff]   ;;  %v3475_v63 = vld [vmem:[#allocation5 + $0xc8] ss:$16 sps:$4 sm:$0xff]   ;;  %v3477_v0 = vld [vmem:[#allocation5 + $0xa4] ss:$16 sps:$4 sm:$0xff]  }
 0x113   :  { %667 = vmatpush1.bf16.msra.mxu1 %v2872_v37  ;;  %720 = vmatpush1.bf16.msra.mxu0 %v2873_v38  ;;  %v3481_v1 = vld [vmem:[#allocation5 + $0xac] ss:$16 sps:$4 sm:$0xff]   ;;  %v3485_v2 = vld [vmem:[#allocation5 + $0xa0] ss:$16 sps:$4 sm:$0xff]   ;;  %v3487_v3 = vld [vmem:[#allocation5 + $0xa8] ss:$16 sps:$4 sm:$0xff]  }
 0x114   :  { %668 = vmatprep.subr.bf16.mxu1 %v2874_v39  ;;  %721 = vmatprep.subr.bf16.mxu0 %v2876_v40  ;;  %v3493_v5 = vld [vmem:[#allocation5 + $0x84] ss:$16 sps:$4 sm:$0xff]   ;;  %v3497_v6 = vld [vmem:[#allocation5 + $0x8c] ss:$16 sps:$4 sm:$0xff]   ;;  %v3501_v7 = vld [vmem:[#allocation5 + $0x80] ss:$16 sps:$4 sm:$0xff]  }
 0x115   :  { %v3503_v8 = vld [vmem:[#allocation5 + $0x88] ss:$16 sps:$4 sm:$0xff]   ;;  %v3507_v9 = vld [vmem:[#allocation5 + $0x64] ss:$16 sps:$4 sm:$0xff]   ;;  %v3509_v10 = vld [vmem:[#allocation5 + $0x6c] ss:$16 sps:$4 sm:$0xff]  }
 0x116   :  { %v3515_v11 = vld [vmem:[#allocation5 + $0x60] ss:$16 sps:$4 sm:$0xff]   ;;  %v3517_v12 = vld [vmem:[#allocation5 + $0x68] ss:$16 sps:$4 sm:$0xff]   ;;  %v3521_v13 = vld [vmem:[#allocation5 + $0x44] ss:$16 sps:$4 sm:$0xff]  }
 0x117   :  { %669 = vmatpush1.bf16.msra.mxu1 %v2878_v41  ;;  %722 = vmatpush1.bf16.msra.mxu0 %v2879_v42  ;;  %v3523_v14 = vld [vmem:[#allocation5 + $0x4c] ss:$16 sps:$4 sm:$0xff]   ;;  %v3527_v15 = vld [vmem:[#allocation5 + $0x40] ss:$16 sps:$4 sm:$0xff]   ;;  %v3529_v16 = vld [vmem:[#allocation5 + $0x48] ss:$16 sps:$4 sm:$0xff]  }
 0x118   :  { %670 = vmatprep.subr.bf16.mxu1 %v2880_v43  ;;  %723 = vmatprep.subr.bf16.mxu0 %v2882_v44  ;;  %v3533_v17 = vld [vmem:[#allocation5 + $0x24] ss:$16 sps:$4 sm:$0xff]   ;;  %v3535_v18 = vld [vmem:[#allocation5 + $0x2c] ss:$16 sps:$4 sm:$0xff]   ;;  %v3539_v19 = vld [vmem:[#allocation5 + $0x20] ss:$16 sps:$4 sm:$0xff]  }
 0x119   :  { %v3541_v20 = vld [vmem:[#allocation5 + $0x28] ss:$16 sps:$4 sm:$0xff]   ;;  %v3545_v21 = vld [vmem:[#allocation5 + $0x4] ss:$16 sps:$4 sm:$0xff]   ;;  %v3547_v23 = vld [vmem:[#allocation5 + $0xc] ss:$16 sps:$4 sm:$0xff]  }
 0x11a   :  { %v3551_v24 = vld [vmem:[#allocation5] ss:$16 sps:$4 sm:$0xff]   ;;  %v3553_v25 = vld [vmem:[#allocation5 + $0x8] ss:$16 sps:$4 sm:$0xff]   ;;  %v3597_v27 = vshrl.u32 %v480_v26, 7 }
 0x11b   :  { %671 = vmatpush1.bf16.msra.mxu1 %v2884_v45  ;;  %724 = vmatpush1.bf16.msra.mxu0 %v2885_v46  ;;  %v472_v31 = vld [vmem:[%s4042_s5] sm:$0xf] }
 0x11c   :  { %672 = vmatprep.subr.bf16.mxu1 %v2886_v47  ;;  %725 = vmatprep.subr.bf16.mxu0 %v2888_v48  ;;  %4054 = vst [vmem:[#allocation24_spill] sm:$0xff] %v3597_v27  ;;  %v4049_v28 = vsub.s32 2, %v3597_v27  ;;  %v4048_v29 = vsub.s32 0, %v3597_v27  ;;  %v4047_v30 = vsub.s32 3, %v3597_v27  ;;  %v4046_v34 = vsub.s32 1, %v3597_v27 }
 0x11e   :  { %v491_v35 = vrot.slane %v472_v31, %v4049_v28  ;;  %v483_v38 = vrot.slane %v472_v31, %v4048_v29  ;;  %v495_v39 = vrot.slane %v472_v31, %v4047_v30  ;;  %v487_v42 = vrot.slane %v472_v31, %v4046_v34 }
 0x11f   :  { %673 = vmatpush1.bf16.msra.mxu1 %v2890_v49  ;;  %726 = vmatpush1.bf16.msra.mxu0 %v2891_v50 }
 0x120   :  { %674 = vmatprep.subr.bf16.mxu1 %v2892_v51  ;;  %727 = vmatprep.subr.bf16.mxu0 %v2894_v52 }
 0x123   :  { %675 = vmatpush1.bf16.msra.mxu1 %v2896_v53  ;;  %728 = vmatpush1.bf16.msra.mxu0 %v2897_v54 }
 0x124   :  { %946 = vmatprep.subr.bf16.mxu1 %v3455_v55  ;;  %987 = vmatprep.subr.bf16.mxu0 %v3457_v56 }
 0x126   :  { %693 = vmatmul.mubr.bf16.vlgmr.msra.gmra.mxu1 %v477_v57  ;;  %746 = vmatmul.mubr.bf16.vlgmr.msra.gmra.mxu0 %v477_v57 }
 0x127   :  { %947 = vmatpush1.bf16.msra.mxu1 %v3461_v58  ;;  %988 = vmatpush1.bf16.msra.mxu0 %v3463_v59 }
 0x128   :  { %948 = vmatprep.subr.bf16.mxu1 %v3465_v60  ;;  %989 = vmatprep.subr.bf16.mxu0 %v3469_v61 }
 0x129   :  { %702 = vmatprep.mubr.bf16.mxu1 %v4050_v22  ;;  %755 = vmatprep.mubr.bf16.mxu0 %v4050_v22 }
 0x12b   :  { %949 = vmatpush1.bf16.msra.mxu1 %v3471_v62  ;;  %990 = vmatpush1.bf16.msra.mxu0 %v3475_v63 }
 0x12c   :  { %950 = vmatprep.subr.bf16.mxu1 %v3477_v0  ;;  %991 = vmatprep.subr.bf16.mxu0 %v3481_v1 }
 0x12e   :  { %703 = vmatmul.mubr.bf16.gmra.mxu1 %v478_v4  ;;  %756 = vmatmul.mubr.bf16.gmra.mxu0 %v478_v4 }
 0x12f   :  { %951 = vmatpush1.bf16.msra.mxu1 %v3485_v2  ;;  %992 = vmatpush1.bf16.msra.mxu0 %v3487_v3 }
 0x130   :  { %952 = vmatprep.subr.bf16.mxu1 %v3493_v5  ;;  %993 = vmatprep.subr.bf16.mxu0 %v3497_v6 }
 0x131   :  { %978 = vmatprep.mubr.bf16.mxu1 %v4050_v22  ;;  %1019 = vmatprep.mubr.bf16.mxu0 %v4050_v22 }
 0x133   :  { %953 = vmatpush1.bf16.msra.mxu1 %v3501_v7  ;;  %994 = vmatpush1.bf16.msra.mxu0 %v3503_v8 }
 0x134   :  { %954 = vmatprep.subr.bf16.mxu1 %v3507_v9  ;;  %995 = vmatprep.subr.bf16.mxu0 %v3509_v10 }
 0x137   :  { %955 = vmatpush1.bf16.msra.mxu1 %v3515_v11  ;;  %996 = vmatpush1.bf16.msra.mxu0 %v3517_v12 }
 0x138   :  { %956 = vmatprep.subr.bf16.mxu1 %v3521_v13  ;;  %997 = vmatprep.subr.bf16.mxu0 %v3523_v14 }
 0x13b   :  { %957 = vmatpush1.bf16.msra.mxu1 %v3527_v15  ;;  %998 = vmatpush1.bf16.msra.mxu0 %v3529_v16 }
 0x13c   :  { %958 = vmatprep.subr.bf16.mxu1 %v3533_v17  ;;  %999 = vmatprep.subr.bf16.mxu0 %v3535_v18 }
 0x13f   :  { %959 = vmatpush1.bf16.msra.mxu1 %v3539_v19  ;;  %1000 = vmatpush1.bf16.msra.mxu0 %v3541_v20 }
 0x140   :  { %960 = vmatprep.subr.bf16.mxu1 %v3545_v21  ;;  %1001 = vmatprep.subr.bf16.mxu0 %v3547_v23 }
 0x143   :  { %961 = vmatpush1.bf16.msra.mxu1 %v3551_v24  ;;  %1002 = vmatpush1.bf16.msra.mxu0 %v3553_v25 }
 0x144   :  { %1063 = vmatprep.subr.bf16.mxu1 %v3455_v55  ;;  %1104 = vmatprep.subr.bf16.mxu0 %v3457_v56 }
 0x146   :  { %979 = vmatmul.mubr.bf16.vlgmr.msra.gmra.mxu1 %v4050_v22  ;;  %1020 = vmatmul.mubr.bf16.vlgmr.msra.gmra.mxu0 %v4050_v22 }
 0x147   :  { %1064 = vmatpush1.bf16.msra.mxu1 %v3461_v58  ;;  %1105 = vmatpush1.bf16.msra.mxu0 %v3463_v59 }
 0x148   :  { %1065 = vmatprep.subr.bf16.mxu1 %v3465_v60  ;;  %1106 = vmatprep.subr.bf16.mxu0 %v3469_v61 }
 0x149   :  { %1095 = vmatprep.mubr.bf16.mxu1 %v4050_v22  ;;  %1136 = vmatprep.mubr.bf16.mxu0 %v4050_v22 }
 0x14b   :  { %1066 = vmatpush1.bf16.msra.mxu1 %v3471_v62  ;;  %1107 = vmatpush1.bf16.msra.mxu0 %v3475_v63 }
 0x14c   :  { %1067 = vmatprep.subr.bf16.mxu1 %v3477_v0  ;;  %1108 = vmatprep.subr.bf16.mxu0 %v3481_v1 }
 0x14f   :  { %1068 = vmatpush1.bf16.msra.mxu1 %v3485_v2  ;;  %1109 = vmatpush1.bf16.msra.mxu0 %v3487_v3 }
 0x150   :  { %1069 = vmatprep.subr.bf16.mxu1 %v3493_v5  ;;  %1110 = vmatprep.subr.bf16.mxu0 %v3497_v6 }
 0x153   :  { %1070 = vmatpush1.bf16.msra.mxu1 %v3501_v7  ;;  %1111 = vmatpush1.bf16.msra.mxu0 %v3503_v8 }
 0x154   :  { %1071 = vmatprep.subr.bf16.mxu1 %v3507_v9  ;;  %1112 = vmatprep.subr.bf16.mxu0 %v3509_v10 }
 0x157   :  { %1072 = vmatpush1.bf16.msra.mxu1 %v3515_v11  ;;  %1113 = vmatpush1.bf16.msra.mxu0 %v3517_v12 }
 0x158   :  { %1073 = vmatprep.subr.bf16.mxu1 %v3521_v13  ;;  %1114 = vmatprep.subr.bf16.mxu0 %v3523_v14 }
 0x15b   :  { %1074 = vmatpush1.bf16.msra.mxu1 %v3527_v15  ;;  %1115 = vmatpush1.bf16.msra.mxu0 %v3529_v16 }
 0x15c   :  { %1075 = vmatprep.subr.bf16.mxu1 %v3533_v17  ;;  %1116 = vmatprep.subr.bf16.mxu0 %v3535_v18 }
 0x15f   :  { %1076 = vmatpush1.bf16.msra.mxu1 %v3539_v19  ;;  %1117 = vmatpush1.bf16.msra.mxu0 %v3541_v20 }
 0x160   :  { %1077 = vmatprep.subr.bf16.mxu1 %v3545_v21  ;;  %1118 = vmatprep.subr.bf16.mxu0 %v3547_v23 }
 0x163   :  { %1078 = vmatpush1.bf16.msra.mxu1 %v3551_v24  ;;  %1119 = vmatpush1.bf16.msra.mxu0 %v3553_v25 }
 0x164   :  { %1181 = vmatprep.subr.bf16.mxu1 %v3455_v55  ;;  %1222 = vmatprep.subr.bf16.mxu0 %v3457_v56 }
 0x1e6   :  { %v694_v32 = vpop.f32.mrf.mxu1  ;;  %v747_v33 = vpop.f32.mrf.mxu0 }
 0x1e8   :  { %v696_v36 = vpop.f32.mrf.mxu1  ;;  %v749_v37 = vpop.f32.mrf.mxu0 }
 0x1e9   :  { %v697_v28 = vadd.f32 %v696_v36, %v487_v42 }
 0x1ea   :  { %v698_v40 = vpop.f32.mrf.mxu1  ;;  %v751_v41 = vpop.f32.mrf.mxu0 }
 0x1eb   :  { %v3614_v43 = vadd.f32 %v698_v40, %v483_v38  ;;  %v3616_v44 = vadd.f32 %v751_v41, %v491_v35 }
 0x1ec   :  { %v700_v45 = vpop.f32.mrf.mxu1  ;;  %v753_v46 = vpop.f32.mrf.mxu0 }
 0x1ed   :  { %v3618_v47 = vadd.f32 %v700_v45, %v487_v42  ;;  %v3620_v48 = vadd.f32 %v753_v46, %v495_v39 }
 0x1ee   :  { %v704_v49 = vpop.f32.mrf.mxu1  ;;  %v757_v50 = vpop.f32.mrf.mxu0 }
 0x1ef   :  { %v3622_v51 = vadd.f32 %v704_v49, %v483_v38  ;;  %v3624_v52 = vadd.f32 %v757_v50, %v491_v35  ;;  %v695_v50 = vadd.f32 %v694_v32, %v483_v38 }
 0x1f0   :  { %v706_v53 = vpop.f32.mrf.mxu1  ;;  %v759_v54 = vpop.f32.mrf.mxu0 }
 0x1f1   :  { %4055 = vst [vmem:[#allocation25_spill] sm:$0xff] %v3624_v52  ;;  %v3626_v57 = vadd.f32 %v706_v53, %v487_v42  ;;  %v3628_v4 = vadd.f32 %v759_v54, %v495_v39 }
 0x1f2   :  { %v708_v26 = vpop.f32.mrf.mxu1  ;;  %v761_v31 = vpop.f32.mrf.mxu0 }
 0x1f3   :  { %4056 = vst [vmem:[#allocation26_spill] sm:$0xff] %v3626_v57  ;;  %4057 = vst [vmem:[#allocation27_spill] sm:$0xff] %v3628_v4  ;;  %v3630_v40 = vadd.f32 %v708_v26, %v483_v38  ;;  %v3632_v41 = vadd.f32 %v761_v31, %v491_v35 }
 0x1f4   :  { %v710_v45 = vpop.f32.mrf.mxu1  ;;  %v763_v46 = vpop.f32.mrf.mxu0 }
 0x1f5   :  { %4058 = vst [vmem:[#allocation28_spill] sm:$0xff] %v3630_v40  ;;  %4059 = vst [vmem:[#allocation29_spill] sm:$0xff] %v3632_v41  ;;  %v3634_v34 = vadd.f32 %v710_v45, %v487_v42  ;;  %v3636_v49 = vadd.f32 %v763_v46, %v495_v39  ;;  %v748_v45 = vadd.f32 %v747_v33, %v491_v35 }
 0x1f6   :  { %v750_v46 = vadd.f32 %v749_v37, %v495_v39  ;;  %v4062_v39 = vmov 0  }
 0x1f7   :  { %4060 = vst [vmem:[#allocation30_spill] sm:$0xff] %v3634_v34  ;;  %4061 = vst [vmem:[#allocation31_spill] sm:$0xff] %v3636_v49 }
 0x206   :  { %v980_v30 = vpop.f32.mrf.mxu1  ;;  %v1021_v29 = vpop.f32.mrf.mxu0 }
 0x207   :  { %v1028_v53 = vadd.f32 %v980_v30, %v695_v50  ;;  %v1030_v34 = vadd.f32 %v1021_v29, %v748_v45 }
 0x208   :  { %v982_v22 = vpop.f32.mrf.mxu1  ;;  %v1023_v54 = vpop.f32.mrf.mxu0 }
 0x209   :  { %v2663_v27 = vmul.f32 -1.442695, %v1028_v53  ;;  %v1029_v4 = vadd.f32 %v982_v22, %v697_v28  ;;  %v2665_v49 = vmul.f32 -1.442695, %v1030_v34  ;;  %v1031_v38 = vadd.f32 %v1023_v54, %v750_v46 }
 0x20a   :  { %v984_v52 = vpop.f32.mrf.mxu1  ;;  %v1025_v26 = vpop.f32.mrf.mxu0 }
 0x20b   :  { %2946 = vpow2.f32 %v2663_v27  ;;  %v2664_v31 = vmul.f32 -1.442695, %v1029_v4 }
 0x20c   :  { %v985_v41 = vpop.f32.mrf.mxu1  ;;  %v1026_v40 = vpop.f32.mrf.mxu0 }
 0x20d   :  { %2948 = vpow2.f32 %v2664_v31 }
 0x20e   :  { %2950 = vpow2.f32 %v2665_v49 }
 0x218   :  { %v2947_v32 = vpop.eup %2946 }
 0x219   :  { %v1041_v57 = vadd.f32 1.0, %v2947_v32 }
 0x21a   :  { %v2949_v36 = vpop.eup %2948 }
 0x21b   :  { %2952 = vrcp.f32 %v1041_v57  ;;  %v1042_v30 = vadd.f32 1.0, %v2949_v36  ;;  %v2951_v22 = vpop.eup %2950 }
 0x21c   :  { %2954 = vtanh.f32 %v1031_v38  ;;  %v1043_v52 = vadd.f32 1.0, %v2951_v22 }
 0x21d   :  { %2956 = vrcp.f32 %v1042_v30 }
 0x21e   :  { %2958 = vrcp.f32 %v1043_v52 }
 0x228   :  { %v2953_v28 = vpop.eup %2952 }
 0x229   :  { %v2955_v27 = vpop.eup %2954 }
 0x22a   :  { %v2957_v42 = vpop.eup %2956  ;;  %v1052_v40 = vmul.f32 %v2955_v27, %v2953_v28 }
 0x22b   :  { %v1051_v4 = vmul.f32 0.0, %v2957_v42  ;;  %v2959_v29 = vpop.eup %2958 }
 0x22d   :  { %v3638_v33 = vadd.f32 %v1052_v40, %v1051_v4 }
 0x22f   :  { %2960 = vtanh.f32 %v3638_v33 }
 0x23c   :  { %v2961_v34 = vpop.eup %2960 }
 0x23d   :  { %v3641_v35 = vmul.f32 %v2961_v34, %v2959_v29 }
 0x23f   :  { %v1062_v37 = vpack.c.bf16 %v3641_v35, %v3641_v35 }
 0x241   :  { %1096 = vmatmul.mubr.bf16.vlgmr.msra.gmra.mxu1 %v1062_v37  ;;  %1137 = vmatmul.mubr.bf16.vlgmr.msra.gmra.mxu0 %v1062_v37 }
 0x242   :  { %1182 = vmatpush1.bf16.msra.mxu1 %v3461_v58  ;;  %1223 = vmatpush1.bf16.msra.mxu0 %v3463_v59 }
 0x243   :  { %1183 = vmatprep.subr.bf16.mxu1 %v3465_v60  ;;  %1224 = vmatprep.subr.bf16.mxu0 %v3469_v61 }
 0x244   :  { %1213 = vmatprep.mubr.bf16.mxu1 %v4062_v39  ;;  %1254 = vmatprep.mubr.bf16.mxu0 %v4062_v39 }
 0x246   :  { %1184 = vmatpush1.bf16.msra.mxu1 %v3471_v62  ;;  %1225 = vmatpush1.bf16.msra.mxu0 %v3475_v63 }
 0x247   :  { %1185 = vmatprep.subr.bf16.mxu1 %v3477_v0  ;;  %1226 = vmatprep.subr.bf16.mxu0 %v3481_v1 }
 0x24a   :  { %1186 = vmatpush1.bf16.msra.mxu1 %v3485_v2  ;;  %1227 = vmatpush1.bf16.msra.mxu0 %v3487_v3 }
 0x24b   :  { %1187 = vmatprep.subr.bf16.mxu1 %v3493_v5  ;;  %1228 = vmatprep.subr.bf16.mxu0 %v3497_v6 }
 0x24e   :  { %1188 = vmatpush1.bf16.msra.mxu1 %v3501_v7  ;;  %1229 = vmatpush1.bf16.msra.mxu0 %v3503_v8 }
 0x24f   :  { %1189 = vmatprep.subr.bf16.mxu1 %v3507_v9  ;;  %1230 = vmatprep.subr.bf16.mxu0 %v3509_v10 }
 0x252   :  { %1190 = vmatpush1.bf16.msra.mxu1 %v3515_v11  ;;  %1231 = vmatpush1.bf16.msra.mxu0 %v3517_v12 }
 0x253   :  { %1191 = vmatprep.subr.bf16.mxu1 %v3521_v13  ;;  %1232 = vmatprep.subr.bf16.mxu0 %v3523_v14 }
 0x256   :  { %1192 = vmatpush1.bf16.msra.mxu1 %v3527_v15  ;;  %1233 = vmatpush1.bf16.msra.mxu0 %v3529_v16 }
 0x257   :  { %1193 = vmatprep.subr.bf16.mxu1 %v3533_v17  ;;  %1234 = vmatprep.subr.bf16.mxu0 %v3535_v18 }
 0x25a   :  { %1194 = vmatpush1.bf16.msra.mxu1 %v3539_v19  ;;  %1235 = vmatpush1.bf16.msra.mxu0 %v3541_v20 }
 0x25b   :  { %1195 = vmatprep.subr.bf16.mxu1 %v3545_v21  ;;  %1236 = vmatprep.subr.bf16.mxu0 %v3547_v23 }
 0x25e   :  { %1196 = vmatpush1.bf16.msra.mxu1 %v3551_v24  ;;  %1237 = vmatpush1.bf16.msra.mxu0 %v3553_v25 }
 0x25f   :  { %1299 = vmatprep.subr.bf16.mxu1 %v3455_v55  ;;  %1340 = vmatprep.subr.bf16.mxu0 %v3457_v56 }
 0x301   :  { %v1097_v57 = vpop.f32.mrf.mxu1  ;;  %v1138_v41 = vpop.f32.mrf.mxu0 }
 0x302   :  { %v1145_v49 = vadd.f32 %v1097_v57, %v3614_v43  ;;  %v1147_v55 = vadd.f32 %v1138_v41, %v3616_v44 }
 0x303   :  { %v1099_v50 = vpop.f32.mrf.mxu1  ;;  %v1140_v53 = vpop.f32.mrf.mxu0 }
 0x304   :  { %v2666_v54 = vmul.f32 -1.442695, %v1145_v49  ;;  %v1146_v26 = vadd.f32 %v1099_v50, %v3618_v47  ;;  %v2668_v36 = vmul.f32 -1.442695, %v1147_v55  ;;  %v1148_v56 = vadd.f32 %v1140_v53, %v3620_v48 }
 0x305   :  { %v1101_v31 = vpop.f32.mrf.mxu1  ;;  %v1142_v45 = vpop.f32.mrf.mxu0 }
 0x306   :  { %2962 = vpow2.f32 %v2666_v54  ;;  %v2667_v46 = vmul.f32 -1.442695, %v1146_v26  ;;  %v4066_v54 = vld [vmem:[#allocation28_spill] sm:$0xff] }
 0x307   :  { %v1102_v32 = vpop.f32.mrf.mxu1  ;;  %v1143_v38 = vpop.f32.mrf.mxu0 }
 0x308   :  { %2964 = vpow2.f32 %v2667_v46  ;;  %v4067_v32 = vld [vmem:[#allocation30_spill] sm:$0xff] }
 0x309   :  { %2966 = vpow2.f32 %v2668_v36 }
 0x30a   :  { %2968 = vtanh.f32 %v1148_v56 }
 0x313   :  { %v2963_v30 = vpop.eup %2962 }
 0x314   :  { %v1158_v22 = vadd.f32 1.0, %v2963_v30 }
 0x315   :  { %v2965_v43 = vpop.eup %2964 }
 0x316   :  { %2970 = vrcp.f32 %v1158_v22  ;;  %v1159_v28 = vadd.f32 1.0, %v2965_v43  ;;  %v2967_v47 = vpop.eup %2966  ;;  %v4068_v43 = vld [vmem:[#allocation29_spill] sm:$0xff] }
 0x317   :  { %v2969_v27 = vpop.eup %2968  ;;  %v1160_v40 = vadd.f32 1.0, %v2967_v47 }
 0x318   :  { %2972 = vrcp.f32 %v1159_v28 }
 0x319   :  { %2974 = vrcp.f32 %v1160_v40 }
 0x323   :  { %v2971_v42 = vpop.eup %2970 }
 0x324   :  { %v1169_v52 = vmul.f32 %v2971_v42, %v2969_v27  ;;  %v4069_v27 = vld [vmem:[#allocation31_spill] sm:$0xff] }
 0x325   :  { %v2973_v4 = vpop.eup %2972 }
 0x326   :  { %v1168_v29 = vmul.f32 %v2973_v4, %v3638_v33  ;;  %v2975_v48 = vpop.eup %2974 }
 0x328   :  { %v3684_v44 = vadd.f32 %v1169_v52, %v1168_v29 }
 0x32a   :  { %2976 = vtanh.f32 %v3684_v44 }
 0x337   :  { %v2977_v34 = vpop.eup %2976 }
 0x338   :  { %v3687_v37 = vmul.f32 %v2977_v34, %v2975_v48 }
 0x33a   :  { %v1180_v57 = vpack.c.bf16 %v3687_v37, %v3687_v37 }
 0x33c   :  { %1214 = vmatmul.mubr.bf16.vlgmr.msra.gmra.mxu1 %v1180_v57  ;;  %1255 = vmatmul.mubr.bf16.vlgmr.msra.gmra.mxu0 %v1180_v57 }
 0x33d   :  { %1300 = vmatpush1.bf16.msra.mxu1 %v3461_v58  ;;  %1341 = vmatpush1.bf16.msra.mxu0 %v3463_v59 }
 0x33e   :  { %1301 = vmatprep.subr.bf16.mxu1 %v3465_v60  ;;  %1342 = vmatprep.subr.bf16.mxu0 %v3469_v61 }
 0x33f   :  { %1331 = vmatprep.mubr.bf16.mxu1 %v4062_v39  ;;  %1372 = vmatprep.mubr.bf16.mxu0 %v4062_v39 }
 0x341   :  { %1302 = vmatpush1.bf16.msra.mxu1 %v3471_v62  ;;  %1343 = vmatpush1.bf16.msra.mxu0 %v3475_v63 }
 0x342   :  { %1303 = vmatprep.subr.bf16.mxu1 %v3477_v0  ;;  %1344 = vmatprep.subr.bf16.mxu0 %v3481_v1  ;;  %v4063_v0 = vld [vmem:[#allocation26_spill] sm:$0xff] }
 0x345   :  { %1304 = vmatpush1.bf16.msra.mxu1 %v3485_v2  ;;  %1345 = vmatpush1.bf16.msra.mxu0 %v3487_v3 }
 0x346   :  { %1305 = vmatprep.subr.bf16.mxu1 %v3493_v5  ;;  %1346 = vmatprep.subr.bf16.mxu0 %v3497_v6 }
 0x349   :  { %1306 = vmatpush1.bf16.msra.mxu1 %v3501_v7  ;;  %1347 = vmatpush1.bf16.msra.mxu0 %v3503_v8  ;;  %v4064_v8 = vld [vmem:[#allocation25_spill] sm:$0xff] }
 0x34a   :  { %1307 = vmatprep.subr.bf16.mxu1 %v3507_v9  ;;  %1348 = vmatprep.subr.bf16.mxu0 %v3509_v10 }
 0x34d   :  { %1308 = vmatpush1.bf16.msra.mxu1 %v3515_v11  ;;  %1349 = vmatpush1.bf16.msra.mxu0 %v3517_v12  ;;  %v4065_v11 = vld [vmem:[#allocation27_spill] sm:$0xff] }
 0x34e   :  { %1309 = vmatprep.subr.bf16.mxu1 %v3521_v13  ;;  %1350 = vmatprep.subr.bf16.mxu0 %v3523_v14 }
 0x351   :  { %1310 = vmatpush1.bf16.msra.mxu1 %v3527_v15  ;;  %1351 = vmatpush1.bf16.msra.mxu0 %v3529_v16 }
 0x352   :  { %1311 = vmatprep.subr.bf16.mxu1 %v3533_v17  ;;  %1352 = vmatprep.subr.bf16.mxu0 %v3535_v18 }
 0x355   :  { %1312 = vmatpush1.bf16.msra.mxu1 %v3539_v19  ;;  %1353 = vmatpush1.bf16.msra.mxu0 %v3541_v20 }
 0x356   :  { %1313 = vmatprep.subr.bf16.mxu1 %v3545_v21  ;;  %1354 = vmatprep.subr.bf16.mxu0 %v3547_v23 }
 0x359   :  { %1314 = vmatpush1.bf16.msra.mxu1 %v3551_v24  ;;  %1355 = vmatpush1.bf16.msra.mxu0 %v3553_v25 }
 0x3fc   :  { %v1215_v58 = vpop.f32.mrf.mxu1  ;;  %v1256_v59 = vpop.f32.mrf.mxu0 }
 0x3fd   :  { %v1263_v60 = vadd.f32 %v1215_v58, %v3622_v51  ;;  %v1265_v9 = vadd.f32 %v1256_v59, %v4064_v8 }
 0x3fe   :  { %v1217_v61 = vpop.f32.mrf.mxu1  ;;  %v1258_v62 = vpop.f32.mrf.mxu0 }
 0x3ff   :  { %v2669_v63 = vmul.f32 -1.442695, %v1263_v60  ;;  %v1264_v1 = vadd.f32 %v1217_v61, %v4063_v0  ;;  %v2671_v10 = vmul.f32 -1.442695, %v1265_v9  ;;  %v1266_v12 = vadd.f32 %v1258_v62, %v4065_v11 }
 0x400   :  { %v1219_v2 = vpop.f32.mrf.mxu1  ;;  %v1260_v3 = vpop.f32.mrf.mxu0 }
 0x401   :  { %2978 = vpow2.f32 %v2669_v63  ;;  %v2670_v5 = vmul.f32 -1.442695, %v1264_v1 }
 0x402   :  { %v1220_v6 = vpop.f32.mrf.mxu1  ;;  %v1261_v7 = vpop.f32.mrf.mxu0 }
 0x403   :  { %2980 = vpow2.f32 %v2670_v5 }
 0x404   :  { %2982 = vpow2.f32 %v2671_v10 }
 0x405   :  { %2984 = vtanh.f32 %v1266_v12 }
 0x40e   :  { %v2979_v13 = vpop.eup %2978 }
 0x40f   :  { %v1276_v14 = vadd.f32 1.0, %v2979_v13 }
 0x410   :  { %v2981_v15 = vpop.eup %2980 }
 0x411   :  { %2986 = vrcp.f32 %v1276_v14  ;;  %v1277_v16 = vadd.f32 1.0, %v2981_v15  ;;  %v2983_v17 = vpop.eup %2982 }
 0x412   :  { %v2985_v18 = vpop.eup %2984  ;;  %v1278_v23 = vadd.f32 1.0, %v2983_v17 }
 0x413   :  { %2988 = vrcp.f32 %v1277_v16 }
 0x414   :  { %2990 = vrcp.f32 %v1278_v23 }
 0x41e   :  { %v2987_v19 = vpop.eup %2986 }
 0x41f   :  { %v1287_v20 = vmul.f32 %v2987_v19, %v2985_v18 }
 0x420   :  { %v2989_v21 = vpop.eup %2988 }
 0x421   :  { %v1286_v24 = vmul.f32 %v2989_v21, %v3684_v44  ;;  %v2991_v51 = vpop.eup %2990 }
 0x423   :  { %v1288_v25 = vadd.f32 %v1287_v20, %v1286_v24 }
 0x425   :  { %2992 = vtanh.f32 %v1288_v25 }
 0x432   :  { %v2993_v33 = vpop.eup %2992 }
 0x433   :  { %v3728_v41 = vmul.f32 %v2993_v33, %v2991_v51 }
 0x435   :  { %v1298_v49 = vpack.c.bf16 %v3728_v41, %v3728_v41 }
 0x437   :  { %1332 = vmatmul.mubr.bf16.vlgmr.msra.gmra.mxu1 %v1298_v49  ;;  %1373 = vmatmul.mubr.bf16.vlgmr.msra.gmra.mxu0 %v1298_v49 }
 0x4f7   :  { %v1333_v50 = vpop.f32.mrf.mxu1  ;;  %v1374_v53 = vpop.f32.mrf.mxu0 }
 0x4f8   :  { %v1381_v26 = vadd.f32 %v1333_v50, %v4066_v54  ;;  %v1383_v28 = vadd.f32 %v1374_v53, %v4068_v43 }
 0x4f9   :  { %v1335_v31 = vpop.f32.mrf.mxu1  ;;  %v1376_v45 = vpop.f32.mrf.mxu0 }
 0x4fa   :  { %v2672_v46 = vmul.f32 -1.442695, %v1381_v26  ;;  %v1382_v38 = vadd.f32 %v1335_v31, %v4067_v32  ;;  %v2674_v47 = vmul.f32 -1.442695, %v1383_v28  ;;  %v1384_v42 = vadd.f32 %v1376_v45, %v4069_v27 }
 0x4fb   :  { %v1337_v55 = vpop.f32.mrf.mxu1  ;;  %v1378_v36 = vpop.f32.mrf.mxu0 }
 0x4fc   :  { %2994 = vpow2.f32 %v2672_v46  ;;  %v2673_v56 = vmul.f32 -1.442695, %v1382_v38 }
 0x4fd   :  { %v1338_v30 = vpop.f32.mrf.mxu1  ;;  %v1379_v22 = vpop.f32.mrf.mxu0 }
 0x4fe   :  { %2996 = vpow2.f32 %v2673_v56 }
 0x4ff   :  { %2998 = vpow2.f32 %v2674_v47 }
 0x500   :  { %3000 = vtanh.f32 %v1384_v42 }
 0x509   :  { %v2995_v52 = vpop.eup %2994 }
 0x50a   :  { %v1394_v4 = vadd.f32 1.0, %v2995_v52 }
 0x50b   :  { %v2997_v40 = vpop.eup %2996 }
 0x50c   :  { %3002 = vrcp.f32 %v1394_v4  ;;  %v1395_v29 = vadd.f32 1.0, %v2997_v40  ;;  %v2999_v44 = vpop.eup %2998 }
 0x50d   :  { %v3001_v48 = vpop.eup %3000  ;;  %v1396_v59 = vadd.f32 1.0, %v2999_v44 }
 0x50e   :  { %3004 = vrcp.f32 %v1395_v29 }
 0x50f   :  { %3006 = vrcp.f32 %v1396_v59 }
 0x519   :  { %v3003_v34 = vpop.eup %3002 }
 0x51a   :  { %v1405_v57 = vmul.f32 %v3003_v34, %v3001_v48 }
 0x51b   :  { %v3005_v58 = vpop.eup %3004 }
 0x51c   :  { %v1404_v60 = vmul.f32 %v3005_v58, %v1288_v25  ;;  %v3007_v62 = vpop.eup %3006 }
 0x51e   :  { %v1406_v61 = vadd.f32 %v1405_v57, %v1404_v60 }
 0x520   :  { %3008 = vtanh.f32 %v1406_v61 }
 0x52d   :  { %v3009_v63 = vpop.eup %3008 }
 0x52e   :  { %v3736_v0 = vmul.f32 %v3009_v63, %v3007_v62 }
 0x52f   :  { %3288 = dma.done.wait [#allocation6 + $0x1], 4096 }
 0x530   :  { %3289 = vsyncadd [#allocation6 + $0x1], 4294963200 }
 0x531   :  { %3290 = dma.done.wait [#allocation6 + $0x3], 4096 }
 0x532   :  { %3291 = vsyncadd [#allocation6 + $0x3], 4294963200  ;;  %1700 = vmatprep.mubr.bf16.mxu1 %v4062_v39  ;;  %1753 = vmatprep.mubr.bf16.mxu0 %v4062_v39  ;;  %v3010_v1 = vld [vmem:[#allocation4 + $0x1e4] ss:$16 sps:$4 sm:$0xff]   ;;  %v3012_v2 = vld [vmem:[#allocation4 + $0x1ec] ss:$16 sps:$4 sm:$0xff]   ;;  %v1485_v38 = vpack.c.bf16 %v3687_v37, %v3641_v35  ;;  %v1486_v27 = vpack.c.bf16 %v3736_v0, %v3728_v41 }
 0x533   :  { %1668 = vmatprep.subr.bf16.mxu1 %v3010_v1  ;;  %v3014_v3 = vld [vmem:[#allocation4 + $0x1e0] ss:$16 sps:$4 sm:$0xff]   ;;  %v3015_v5 = vld [vmem:[#allocation4 + $0x1e8] ss:$16 sps:$4 sm:$0xff]   ;;  %1721 = vmatprep.subr.bf16.mxu0 %v3012_v2  ;;  %v3016_v6 = vld [vmem:[#allocation4 + $0x1c4] ss:$16 sps:$4 sm:$0xff]  }
 0x534   :  { %1669 = vmatpush1.bf16.msra.mxu1 %v3014_v3  ;;  %1722 = vmatpush1.bf16.msra.mxu0 %v3015_v5  ;;  %v3018_v7 = vld [vmem:[#allocation4 + $0x1cc] ss:$16 sps:$4 sm:$0xff]   ;;  %v3020_v8 = vld [vmem:[#allocation4 + $0x1c0] ss:$16 sps:$4 sm:$0xff]   ;;  %v3021_v9 = vld [vmem:[#allocation4 + $0x1c8] ss:$16 sps:$4 sm:$0xff]  }
 0x535   :  { %1670 = vmatprep.subr.bf16.mxu1 %v3016_v6  ;;  %1723 = vmatprep.subr.bf16.mxu0 %v3018_v7  ;;  %v3022_v10 = vld [vmem:[#allocation4 + $0x1a4] ss:$16 sps:$4 sm:$0xff]   ;;  %v3024_v11 = vld [vmem:[#allocation4 + $0x1ac] ss:$16 sps:$4 sm:$0xff]   ;;  %v3026_v12 = vld [vmem:[#allocation4 + $0x1a0] ss:$16 sps:$4 sm:$0xff]  }
 0x536   :  { %v3027_v13 = vld [vmem:[#allocation4 + $0x1a8] ss:$16 sps:$4 sm:$0xff]   ;;  %v3028_v14 = vld [vmem:[#allocation4 + $0x184] ss:$16 sps:$4 sm:$0xff]   ;;  %v3030_v15 = vld [vmem:[#allocation4 + $0x18c] ss:$16 sps:$4 sm:$0xff]  }
 0x537   :  { %v3032_v16 = vld [vmem:[#allocation4 + $0x180] ss:$16 sps:$4 sm:$0xff]   ;;  %v3033_v17 = vld [vmem:[#allocation4 + $0x188] ss:$16 sps:$4 sm:$0xff]   ;;  %v3034_v18 = vld [vmem:[#allocation4 + $0x164] ss:$16 sps:$4 sm:$0xff]  }
 0x538   :  { %1671 = vmatpush1.bf16.msra.mxu1 %v3020_v8  ;;  %1724 = vmatpush1.bf16.msra.mxu0 %v3021_v9  ;;  %v3036_v19 = vld [vmem:[#allocation4 + $0x16c] ss:$16 sps:$4 sm:$0xff]   ;;  %v3038_v20 = vld [vmem:[#allocation4 + $0x160] ss:$16 sps:$4 sm:$0xff]   ;;  %v3039_v21 = vld [vmem:[#allocation4 + $0x168] ss:$16 sps:$4 sm:$0xff]  }
 0x539   :  { %1672 = vmatprep.subr.bf16.mxu1 %v3022_v10  ;;  %1725 = vmatprep.subr.bf16.mxu0 %v3024_v11  ;;  %v3040_v23 = vld [vmem:[#allocation4 + $0x144] ss:$16 sps:$4 sm:$0xff]   ;;  %v3042_v24 = vld [vmem:[#allocation4 + $0x14c] ss:$16 sps:$4 sm:$0xff]   ;;  %v3044_v25 = vld [vmem:[#allocation4 + $0x140] ss:$16 sps:$4 sm:$0xff]  }
 0x53a   :  { %v3045_v51 = vld [vmem:[#allocation4 + $0x148] ss:$16 sps:$4 sm:$0xff]   ;;  %v3046_v33 = vld [vmem:[#allocation4 + $0x124] ss:$16 sps:$4 sm:$0xff]   ;;  %v3048_v49 = vld [vmem:[#allocation4 + $0x12c] ss:$16 sps:$4 sm:$0xff]  }
 0x53b   :  { %v3050_v50 = vld [vmem:[#allocation4 + $0x120] ss:$16 sps:$4 sm:$0xff]   ;;  %v3051_v53 = vld [vmem:[#allocation4 + $0x128] ss:$16 sps:$4 sm:$0xff]   ;;  %v3052_v54 = vld [vmem:[#allocation4 + $0x104] ss:$16 sps:$4 sm:$0xff]  }
 0x53c   :  { %1673 = vmatpush1.bf16.msra.mxu1 %v3026_v12  ;;  %1726 = vmatpush1.bf16.msra.mxu0 %v3027_v13  ;;  %v3054_v26 = vld [vmem:[#allocation4 + $0x10c] ss:$16 sps:$4 sm:$0xff]   ;;  %v3056_v31 = vld [vmem:[#allocation4 + $0x100] ss:$16 sps:$4 sm:$0xff]   ;;  %v3057_v45 = vld [vmem:[#allocation4 + $0x108] ss:$16 sps:$4 sm:$0xff]  }
 0x53d   :  { %1674 = vmatprep.subr.bf16.mxu1 %v3028_v14  ;;  %1727 = vmatprep.subr.bf16.mxu0 %v3030_v15  ;;  %v3740_v46 = vld [vmem:[#allocation5 + $0x1e4] ss:$16 sps:$4 sm:$0xff]   ;;  %v3742_v32 = vld [vmem:[#allocation5 + $0x1ec] ss:$16 sps:$4 sm:$0xff]   ;;  %v3746_v55 = vld [vmem:[#allocation5 + $0x1e0] ss:$16 sps:$4 sm:$0xff]  }
 0x53e   :  { %v3748_v36 = vld [vmem:[#allocation5 + $0x1e8] ss:$16 sps:$4 sm:$0xff]   ;;  %v3750_v56 = vld [vmem:[#allocation5 + $0x1c4] ss:$16 sps:$4 sm:$0xff]   ;;  %v3754_v30 = vld [vmem:[#allocation5 + $0x1cc] ss:$16 sps:$4 sm:$0xff]  }
 0x53f   :  { %v3756_v22 = vld [vmem:[#allocation5 + $0x1c0] ss:$16 sps:$4 sm:$0xff]   ;;  %v3760_v35 = vld [vmem:[#allocation5 + $0x1c8] ss:$16 sps:$4 sm:$0xff]   ;;  %v3762_v37 = vld [vmem:[#allocation5 + $0x1a4] ss:$16 sps:$4 sm:$0xff]  }
 0x540   :  { %1675 = vmatpush1.bf16.msra.mxu1 %v3032_v16  ;;  %1728 = vmatpush1.bf16.msra.mxu0 %v3033_v17  ;;  %v3766_v43 = vld [vmem:[#allocation5 + $0x1ac] ss:$16 sps:$4 sm:$0xff]   ;;  %v3770_v28 = vld [vmem:[#allocation5 + $0x1a0] ss:$16 sps:$4 sm:$0xff]   ;;  %v3772_v47 = vld [vmem:[#allocation5 + $0x1a8] ss:$16 sps:$4 sm:$0xff]  }
 0x541   :  { %1676 = vmatprep.subr.bf16.mxu1 %v3034_v18  ;;  %1729 = vmatprep.subr.bf16.mxu0 %v3036_v19  ;;  %v3778_v42 = vld [vmem:[#allocation5 + $0x184] ss:$16 sps:$4 sm:$0xff]   ;;  %v3782_v52 = vld [vmem:[#allocation5 + $0x18c] ss:$16 sps:$4 sm:$0xff]   ;;  %v3784_v4 = vld [vmem:[#allocation5 + $0x180] ss:$16 sps:$4 sm:$0xff]  }
 0x542   :  { %v3786_v40 = vld [vmem:[#allocation5 + $0x188] ss:$16 sps:$4 sm:$0xff]   ;;  %v3788_v29 = vld [vmem:[#allocation5 + $0x164] ss:$16 sps:$4 sm:$0xff]   ;;  %v3790_v44 = vld [vmem:[#allocation5 + $0x16c] ss:$16 sps:$4 sm:$0xff]  }
 0x543   :  { %v3800_v41 = vld [vmem:[#allocation5 + $0x160] ss:$16 sps:$4 sm:$0xff]   ;;  %v3802_v48 = vld [vmem:[#allocation5 + $0x168] ss:$16 sps:$4 sm:$0xff]   ;;  %v3806_v34 = vld [vmem:[#allocation5 + $0x144] ss:$16 sps:$4 sm:$0xff]  }
 0x544   :  { %1677 = vmatpush1.bf16.msra.mxu1 %v3038_v20  ;;  %1730 = vmatpush1.bf16.msra.mxu0 %v3039_v21  ;;  %v3808_v57 = vld [vmem:[#allocation5 + $0x14c] ss:$16 sps:$4 sm:$0xff]   ;;  %v3812_v58 = vld [vmem:[#allocation5 + $0x140] ss:$16 sps:$4 sm:$0xff]   ;;  %v3814_v59 = vld [vmem:[#allocation5 + $0x148] ss:$16 sps:$4 sm:$0xff]  }
 0x545   :  { %1678 = vmatprep.subr.bf16.mxu1 %v3040_v23  ;;  %1731 = vmatprep.subr.bf16.mxu0 %v3042_v24  ;;  %v3818_v60 = vld [vmem:[#allocation5 + $0x124] ss:$16 sps:$4 sm:$0xff]   ;;  %v3820_v61 = vld [vmem:[#allocation5 + $0x12c] ss:$16 sps:$4 sm:$0xff]   ;;  %v3824_v62 = vld [vmem:[#allocation5 + $0x120] ss:$16 sps:$4 sm:$0xff]  }
 0x546   :  { %v3826_v63 = vld [vmem:[#allocation5 + $0x128] ss:$16 sps:$4 sm:$0xff]   ;;  %v3830_v0 = vld [vmem:[#allocation5 + $0x104] ss:$16 sps:$4 sm:$0xff]   ;;  %v3832_v1 = vld [vmem:[#allocation5 + $0x10c] ss:$16 sps:$4 sm:$0xff]  }
 0x547   :  { %v3836_v2 = vld [vmem:[#allocation5 + $0x100] ss:$16 sps:$4 sm:$0xff]   ;;  %v3838_v3 = vld [vmem:[#allocation5 + $0x108] ss:$16 sps:$4 sm:$0xff]   ;;  %v2675_v5 = vld [vmem:[%s4042_s5 + $0x4] sm:$0xf] }
 0x548   :  { %1679 = vmatpush1.bf16.msra.mxu1 %v3044_v25  ;;  %1732 = vmatpush1.bf16.msra.mxu0 %v3045_v51  ;;  %v4070_v8 = vld [vmem:[#allocation24_spill] sm:$0xff]  ;;  %vm3300_vm2 = vmmov 0   ;;  %s3301_s1 = smov [#allocation7]   ;;  %vm2525_vm3 = vcmask 64512  }
 0x549   :  { %1680 = vmatprep.subr.bf16.mxu1 %v3046_v33  ;;  %1733 = vmatprep.subr.bf16.mxu0 %v3048_v49  ;;  %v4071_v9 = vsub.s32 2, %v4070_v8  ;;  %v4072_v13 = vsub.s32 0, %v4070_v8  ;;  %v4073_v15 = vsub.s32 3, %v4070_v8  ;;  %v4074_v19 = vsub.s32 1, %v4070_v8  ;;  %s2533_s25 = sshll.u32 %s3301_s1, 4  ;;  %s2534_s25 = int_to_ptr.vmem [resolvable:$true] %s2533_s25 }
 0x54a   :  { %s3264_s26 = scalar_lea.vmem %s2534_s25, 128  ;;  %p3269_p7 = scmp.lt.s32.totalorder %s2534_s25, %s2534_s25 }
 0x54b   :  { %v1499_v10 = vrot.slane %v2675_v5, %v4071_v9  ;;  %v1491_v14 = vrot.slane %v2675_v5, %v4072_v13  ;;  %v1503_v16 = vrot.slane %v2675_v5, %v4073_v15  ;;  %v1495_v20 = vrot.slane %v2675_v5, %v4074_v19  ;;  %p3265_p6 = scmp.ne.s32.totalorder %s2534_s25, %s3264_s26  ;;  %p3270_p8 = scmp.lt.s32.totalorder %s3264_s26, %s3264_s26 }
 0x54c   :  { %1681 = vmatpush1.bf16.msra.mxu1 %v3050_v50  ;;  %1734 = vmatpush1.bf16.msra.mxu0 %v3051_v53 }
 0x54d   :  { %1682 = vmatprep.subr.bf16.mxu1 %v3052_v54  ;;  %1735 = vmatprep.subr.bf16.mxu0 %v3054_v26  ;;  %p3271_p9 = por %p3270_p8, %p3269_p7 }
 0x54f   :  { %p3272_p10 = pnand %p3271_p9, %p3265_p6 }
 0x550   :  { %1683 = vmatpush1.bf16.msra.mxu1 %v3056_v31  ;;  %1736 = vmatpush1.bf16.msra.mxu0 %v3057_v45 }
 0x551   :  { %1954 = vmatprep.subr.bf16.mxu1 %v3740_v46  ;;  %1995 = vmatprep.subr.bf16.mxu0 %v3742_v32 }
 0x553   :  { %1701 = vmatmul.mubr.bf16.vlgmr.msra.gmra.mxu1 %v1485_v38  ;;  %1754 = vmatmul.mubr.bf16.vlgmr.msra.gmra.mxu0 %v1485_v38 }
 0x554   :  { %1955 = vmatpush1.bf16.msra.mxu1 %v3746_v55  ;;  %1996 = vmatpush1.bf16.msra.mxu0 %v3748_v36 }
 0x555   :  { %1956 = vmatprep.subr.bf16.mxu1 %v3750_v56  ;;  %1997 = vmatprep.subr.bf16.mxu0 %v3754_v30 }
 0x556   :  { %1710 = vmatprep.mubr.bf16.mxu1 %v4062_v39  ;;  %1763 = vmatprep.mubr.bf16.mxu0 %v4062_v39 }
 0x558   :  { %1957 = vmatpush1.bf16.msra.mxu1 %v3756_v22  ;;  %1998 = vmatpush1.bf16.msra.mxu0 %v3760_v35 }
 0x559   :  { %1958 = vmatprep.subr.bf16.mxu1 %v3762_v37  ;;  %1999 = vmatprep.subr.bf16.mxu0 %v3766_v43 }
 0x55b   :  { %1711 = vmatmul.mubr.bf16.gmra.mxu1 %v1486_v27  ;;  %1764 = vmatmul.mubr.bf16.gmra.mxu0 %v1486_v27 }
 0x55c   :  { %1959 = vmatpush1.bf16.msra.mxu1 %v3770_v28  ;;  %2000 = vmatpush1.bf16.msra.mxu0 %v3772_v47 }
 0x55d   :  { %1960 = vmatprep.subr.bf16.mxu1 %v3778_v42  ;;  %2001 = vmatprep.subr.bf16.mxu0 %v3782_v52 }
 0x55e   :  { %1986 = vmatprep.mubr.bf16.mxu1 %v4062_v39  ;;  %2027 = vmatprep.mubr.bf16.mxu0 %v4062_v39 }
 0x560   :  { %1961 = vmatpush1.bf16.msra.mxu1 %v3784_v4  ;;  %2002 = vmatpush1.bf16.msra.mxu0 %v3786_v40 }
 0x561   :  { %1962 = vmatprep.subr.bf16.mxu1 %v3788_v29  ;;  %2003 = vmatprep.subr.bf16.mxu0 %v3790_v44 }
 0x564   :  { %1963 = vmatpush1.bf16.msra.mxu1 %v3800_v41  ;;  %2004 = vmatpush1.bf16.msra.mxu0 %v3802_v48 }
 0x565   :  { %1964 = vmatprep.subr.bf16.mxu1 %v3806_v34  ;;  %2005 = vmatprep.subr.bf16.mxu0 %v3808_v57 }
 0x568   :  { %1965 = vmatpush1.bf16.msra.mxu1 %v3812_v58  ;;  %2006 = vmatpush1.bf16.msra.mxu0 %v3814_v59 }
 0x569   :  { %1966 = vmatprep.subr.bf16.mxu1 %v3818_v60  ;;  %2007 = vmatprep.subr.bf16.mxu0 %v3820_v61 }
 0x56c   :  { %1967 = vmatpush1.bf16.msra.mxu1 %v3824_v62  ;;  %2008 = vmatpush1.bf16.msra.mxu0 %v3826_v63 }
 0x56d   :  { %1968 = vmatprep.subr.bf16.mxu1 %v3830_v0  ;;  %2009 = vmatprep.subr.bf16.mxu0 %v3832_v1 }
 0x570   :  { %1969 = vmatpush1.bf16.msra.mxu1 %v3836_v2  ;;  %2010 = vmatpush1.bf16.msra.mxu0 %v3838_v3 }
 0x571   :  { %2070 = vmatprep.subr.bf16.mxu1 %v3740_v46  ;;  %2111 = vmatprep.subr.bf16.mxu0 %v3742_v32 }
 0x573   :  { %1987 = vmatmul.mubr.bf16.vlgmr.msra.gmra.mxu1 %v4062_v39  ;;  %2028 = vmatmul.mubr.bf16.vlgmr.msra.gmra.mxu0 %v4062_v39 }
 0x574   :  { %2071 = vmatpush1.bf16.msra.mxu1 %v3746_v55  ;;  %2112 = vmatpush1.bf16.msra.mxu0 %v3748_v36 }
 0x575   :  { %2072 = vmatprep.subr.bf16.mxu1 %v3750_v56  ;;  %2113 = vmatprep.subr.bf16.mxu0 %v3754_v30 }
 0x576   :  { %2102 = vmatprep.mubr.bf16.mxu1 %v4062_v39  ;;  %2143 = vmatprep.mubr.bf16.mxu0 %v4062_v39 }
 0x578   :  { %2073 = vmatpush1.bf16.msra.mxu1 %v3756_v22  ;;  %2114 = vmatpush1.bf16.msra.mxu0 %v3760_v35 }
 0x579   :  { %2074 = vmatprep.subr.bf16.mxu1 %v3762_v37  ;;  %2115 = vmatprep.subr.bf16.mxu0 %v3766_v43 }
 0x57c   :  { %2075 = vmatpush1.bf16.msra.mxu1 %v3770_v28  ;;  %2116 = vmatpush1.bf16.msra.mxu0 %v3772_v47 }
 0x57d   :  { %2076 = vmatprep.subr.bf16.mxu1 %v3778_v42  ;;  %2117 = vmatprep.subr.bf16.mxu0 %v3782_v52 }
 0x580   :  { %2077 = vmatpush1.bf16.msra.mxu1 %v3784_v4  ;;  %2118 = vmatpush1.bf16.msra.mxu0 %v3786_v40 }
 0x581   :  { %2078 = vmatprep.subr.bf16.mxu1 %v3788_v29  ;;  %2119 = vmatprep.subr.bf16.mxu0 %v3790_v44 }
 0x584   :  { %2079 = vmatpush1.bf16.msra.mxu1 %v3800_v41  ;;  %2120 = vmatpush1.bf16.msra.mxu0 %v3802_v48 }
 0x585   :  { %2080 = vmatprep.subr.bf16.mxu1 %v3806_v34  ;;  %2121 = vmatprep.subr.bf16.mxu0 %v3808_v57 }
 0x588   :  { %2081 = vmatpush1.bf16.msra.mxu1 %v3812_v58  ;;  %2122 = vmatpush1.bf16.msra.mxu0 %v3814_v59 }
 0x589   :  { %2082 = vmatprep.subr.bf16.mxu1 %v3818_v60  ;;  %2123 = vmatprep.subr.bf16.mxu0 %v3820_v61 }
 0x58c   :  { %2083 = vmatpush1.bf16.msra.mxu1 %v3824_v62  ;;  %2124 = vmatpush1.bf16.msra.mxu0 %v3826_v63 }
 0x58d   :  { %2084 = vmatprep.subr.bf16.mxu1 %v3830_v0  ;;  %2125 = vmatprep.subr.bf16.mxu0 %v3832_v1 }
 0x590   :  { %2085 = vmatpush1.bf16.msra.mxu1 %v3836_v2  ;;  %2126 = vmatpush1.bf16.msra.mxu0 %v3838_v3 }
 0x591   :  { %2186 = vmatprep.subr.bf16.mxu1 %v3740_v46  ;;  %2227 = vmatprep.subr.bf16.mxu0 %v3742_v32 }
 0x613   :  { %v1702_v6 = vpop.f32.mrf.mxu1  ;;  %v1755_v7 = vpop.f32.mrf.mxu0 }
 0x614   :  { %v1703_v19 = vadd.f32 %v1702_v6, %v1491_v14 }
 0x615   :  { %v1704_v11 = vpop.f32.mrf.mxu1  ;;  %v1757_v12 = vpop.f32.mrf.mxu0 }
 0x617   :  { %v1706_v17 = vpop.f32.mrf.mxu1  ;;  %v1759_v18 = vpop.f32.mrf.mxu0 }
 0x618   :  { %v3893_v21 = vadd.f32 %v1706_v17, %v1491_v14  ;;  %v3895_v23 = vadd.f32 %v1759_v18, %v1499_v10 }
 0x619   :  { %v1708_v24 = vpop.f32.mrf.mxu1  ;;  %v1761_v25 = vpop.f32.mrf.mxu0 }
 0x61a   :  { %v3897_v51 = vadd.f32 %v1708_v24, %v1495_v20  ;;  %v3899_v33 = vadd.f32 %v1761_v25, %v1503_v16 }
 0x61b   :  { %v1712_v49 = vpop.f32.mrf.mxu1  ;;  %v1765_v50 = vpop.f32.mrf.mxu0 }
 0x61c   :  { %v3901_v53 = vadd.f32 %v1712_v49, %v1491_v14  ;;  %v3903_v54 = vadd.f32 %v1765_v50, %v1499_v10  ;;  %v1705_v49 = vadd.f32 %v1704_v11, %v1495_v20 }
 0x61d   :  { %v1714_v26 = vpop.f32.mrf.mxu1  ;;  %v1767_v31 = vpop.f32.mrf.mxu0 }
 0x61e   :  { %4075 = vst [vmem:[#allocation26_spill] sm:$0xff] %v3901_v53  ;;  %4076 = vst [vmem:[#allocation25_spill] sm:$0xff] %v3903_v54  ;;  %v3905_v45 = vadd.f32 %v1714_v26, %v1495_v20  ;;  %v3907_v38 = vadd.f32 %v1767_v31, %v1503_v16 }
 0x61f   :  { %v1716_v27 = vpop.f32.mrf.mxu1  ;;  %v1769_v5 = vpop.f32.mrf.mxu0 }
 0x620   :  { %4077 = vst [vmem:[#allocation27_spill] sm:$0xff] %v3905_v45  ;;  %4078 = vst [vmem:[#allocation28_spill] sm:$0xff] %v3907_v38  ;;  %v3909_v8 = vadd.f32 %v1716_v27, %v1491_v14  ;;  %v3911_v9 = vadd.f32 %v1769_v5, %v1499_v10 }
 0x621   :  { %v1718_v13 = vpop.f32.mrf.mxu1  ;;  %v1771_v15 = vpop.f32.mrf.mxu0 }
 0x622   :  { %4079 = vst [vmem:[#allocation30_spill] sm:$0xff] %v3909_v8  ;;  %4080 = vst [vmem:[#allocation29_spill] sm:$0xff] %v3911_v9  ;;  %v3913_v17 = vadd.f32 %v1718_v13, %v1495_v20  ;;  %v3915_v18 = vadd.f32 %v1771_v15, %v1503_v16  ;;  %v1756_v13 = vadd.f32 %v1755_v7, %v1499_v10 }
 0x623   :  { %v1758_v15 = vadd.f32 %v1757_v12, %v1503_v16 }
 0x624   :  { %4081 = vst [vmem:[#allocation31_spill] sm:$0xff] %v3913_v17  ;;  %4082 = vst [vmem:[#allocation24_spill] sm:$0xff] %v3915_v18 }
 0x633   :  { %v1988_v24 = vpop.f32.mrf.mxu1  ;;  %v2029_v25 = vpop.f32.mrf.mxu0 }
 0x634   :  { %v2036_v50 = vadd.f32 %v1988_v24, %v1703_v19  ;;  %v2038_v17 = vadd.f32 %v2029_v25, %v1756_v13 }
 0x635   :  { %v1990_v26 = vpop.f32.mrf.mxu1  ;;  %v2031_v31 = vpop.f32.mrf.mxu0 }
 0x636   :  { %v2740_v38 = vmul.f32 -1.442695, %v2036_v50  ;;  %v2037_v54 = vadd.f32 %v1990_v26, %v1705_v49  ;;  %v2742_v18 = vmul.f32 -1.442695, %v2038_v17  ;;  %v2039_v14 = vadd.f32 %v2031_v31, %v1758_v15 }
 0x637   :  { %v1992_v45 = vpop.f32.mrf.mxu1  ;;  %v2033_v27 = vpop.f32.mrf.mxu0 }
 0x638   :  { %3114 = vpow2.f32 %v2740_v38  ;;  %v2741_v5 = vmul.f32 -1.442695, %v2037_v54 }
 0x639   :  { %v1993_v9 = vpop.f32.mrf.mxu1  ;;  %v2034_v8 = vpop.f32.mrf.mxu0 }
 0x63a   :  { %3116 = vpow2.f32 %v2741_v5 }
 0x63b   :  { %3118 = vpow2.f32 %v2742_v18 }
 0x645   :  { %v3115_v6 = vpop.eup %3114 }
 0x646   :  { %v2049_v53 = vadd.f32 1.0, %v3115_v6 }
 0x647   :  { %v3117_v11 = vpop.eup %3116 }
 0x648   :  { %3120 = vrcp.f32 %v2049_v53  ;;  %v2050_v20 = vadd.f32 1.0, %v3117_v11  ;;  %v3119_v45 = vpop.eup %3118 }
 0x649   :  { %3122 = vtanh.f32 %v2039_v14  ;;  %v2051_v9 = vadd.f32 1.0, %v3119_v45 }
 0x64a   :  { %3124 = vrcp.f32 %v2050_v20 }
 0x64b   :  { %3126 = vrcp.f32 %v2051_v9 }
 0x655   :  { %v3121_v19 = vpop.eup %3120 }
 0x656   :  { %v3123_v38 = vpop.eup %3122 }
 0x657   :  { %v3125_v54 = vpop.eup %3124  ;;  %v2060_v24 = vmul.f32 %v3123_v38, %v3121_v19 }
 0x658   :  { %v2059_v8 = vmul.f32 0.0, %v3125_v54  ;;  %v3127_v10 = vpop.eup %3126 }
 0x65a   :  { %v3917_v7 = vadd.f32 %v2060_v24, %v2059_v8 }
 0x65c   :  { %3128 = vtanh.f32 %v3917_v7 }
 0x669   :  { %v3129_v12 = vpop.eup %3128 }
 0x66a   :  { %v2063_v16 = vmul.f32 %v3129_v12, %v3127_v10 }
 0x66c   :  { %v2069_v17 = vpack.c.bf16 %v2063_v16, %v2063_v16 }
 0x66e   :  { %2103 = vmatmul.mubr.bf16.vlgmr.msra.gmra.mxu1 %v2069_v17  ;;  %2144 = vmatmul.mubr.bf16.vlgmr.msra.gmra.mxu0 %v2069_v17 }
 0x66f   :  { %2187 = vmatpush1.bf16.msra.mxu1 %v3746_v55  ;;  %2228 = vmatpush1.bf16.msra.mxu0 %v3748_v36 }
 0x670   :  { %2188 = vmatprep.subr.bf16.mxu1 %v3750_v56  ;;  %2229 = vmatprep.subr.bf16.mxu0 %v3754_v30 }
 0x671   :  { %2218 = vmatprep.mubr.bf16.mxu1 %v4062_v39  ;;  %2259 = vmatprep.mubr.bf16.mxu0 %v4062_v39 }
 0x673   :  { %2189 = vmatpush1.bf16.msra.mxu1 %v3756_v22  ;;  %2230 = vmatpush1.bf16.msra.mxu0 %v3760_v35 }
 0x674   :  { %2190 = vmatprep.subr.bf16.mxu1 %v3762_v37  ;;  %2231 = vmatprep.subr.bf16.mxu0 %v3766_v43 }
 0x677   :  { %2191 = vmatpush1.bf16.msra.mxu1 %v3770_v28  ;;  %2232 = vmatpush1.bf16.msra.mxu0 %v3772_v47 }
 0x678   :  { %2192 = vmatprep.subr.bf16.mxu1 %v3778_v42  ;;  %2233 = vmatprep.subr.bf16.mxu0 %v3782_v52 }
 0x67b   :  { %2193 = vmatpush1.bf16.msra.mxu1 %v3784_v4  ;;  %2234 = vmatpush1.bf16.msra.mxu0 %v3786_v40 }
 0x67c   :  { %2194 = vmatprep.subr.bf16.mxu1 %v3788_v29  ;;  %2235 = vmatprep.subr.bf16.mxu0 %v3790_v44 }
 0x67f   :  { %2195 = vmatpush1.bf16.msra.mxu1 %v3800_v41  ;;  %2236 = vmatpush1.bf16.msra.mxu0 %v3802_v48 }
 0x680   :  { %2196 = vmatprep.subr.bf16.mxu1 %v3806_v34  ;;  %2237 = vmatprep.subr.bf16.mxu0 %v3808_v57 }
 0x683   :  { %2197 = vmatpush1.bf16.msra.mxu1 %v3812_v58  ;;  %2238 = vmatpush1.bf16.msra.mxu0 %v3814_v59 }
 0x684   :  { %2198 = vmatprep.subr.bf16.mxu1 %v3818_v60  ;;  %2239 = vmatprep.subr.bf16.mxu0 %v3820_v61 }
 0x687   :  { %2199 = vmatpush1.bf16.msra.mxu1 %v3824_v62  ;;  %2240 = vmatpush1.bf16.msra.mxu0 %v3826_v63 }
 0x688   :  { %2200 = vmatprep.subr.bf16.mxu1 %v3830_v0  ;;  %2241 = vmatprep.subr.bf16.mxu0 %v3832_v1 }
 0x68b   :  { %2201 = vmatpush1.bf16.msra.mxu1 %v3836_v2  ;;  %2242 = vmatpush1.bf16.msra.mxu0 %v3838_v3 }
 0x68c   :  { %2302 = vmatprep.subr.bf16.mxu1 %v3740_v46  ;;  %2343 = vmatprep.subr.bf16.mxu0 %v3742_v32 }
 0x72e   :  { %v2104_v53 = vpop.f32.mrf.mxu1  ;;  %v2145_v18 = vpop.f32.mrf.mxu0 }
 0x72f   :  { %v2152_v25 = vadd.f32 %v2104_v53, %v3893_v21  ;;  %v2154_v46 = vadd.f32 %v2145_v18, %v3895_v23 }
 0x730   :  { %v2106_v49 = vpop.f32.mrf.mxu1  ;;  %v2147_v50 = vpop.f32.mrf.mxu0 }
 0x731   :  { %v2743_v26 = vmul.f32 -1.442695, %v2152_v25  ;;  %v2153_v31 = vadd.f32 %v2106_v49, %v3897_v51  ;;  %v2745_v14 = vmul.f32 -1.442695, %v2154_v46  ;;  %v2155_v32 = vadd.f32 %v2147_v50, %v3899_v33  ;;  %v3106_v25 = vld [vmem:[%s4043_s6 + $0x38] sm:$0xff]   ;;  %v3107_v50 = vld [vmem:[%s4043_s6 + $0x30] sm:$0xff]  }
 0x732   :  { %v2108_v27 = vpop.f32.mrf.mxu1  ;;  %v2149_v5 = vpop.f32.mrf.mxu0  ;;  %v3299_v49 = vmov 0.0  }
 0x733   :  { %3130 = vpow2.f32 %v2743_v26  ;;  %v2744_v13 = vmul.f32 -1.442695, %v2153_v31  ;;  %v3108_v26 = vld [vmem:[%s4043_s6 + $0x28] sm:$0xff]   ;;  %v3109_v31 = vld [vmem:[%s4043_s6 + $0x20] sm:$0xff]   ;;  %v3110_v27 = vld [vmem:[%s4043_s6 + $0x18] sm:$0xff]  }
 0x734   :  { %v2109_v15 = vpop.f32.mrf.mxu1  ;;  %v2150_v6 = vpop.f32.mrf.mxu0  ;;  %v3111_v5 = vld [vmem:[%s4043_s6 + $0x10] sm:$0xff]  }
 0x735   :  { %3132 = vpow2.f32 %v2744_v13  ;;  %v3112_v13 = vld [vmem:[%s4043_s6 + $0x8] sm:$0xff]   ;;  %v3113_v15 = vld [vmem:[%s4043_s6] sm:$0xff]  }
 0x736   :  { %3134 = vpow2.f32 %v2745_v14  ;;  %v4087_v14 = vld [vmem:[#allocation30_spill] sm:$0xff] }
 0x737   :  { %3136 = vtanh.f32 %v2155_v32 }
 0x740   :  { %v3131_v11 = vpop.eup %3130 }
 0x741   :  { %v2165_v20 = vadd.f32 1.0, %v3131_v11 }
 0x742   :  { %v3133_v21 = vpop.eup %3132 }
 0x743   :  { %3138 = vrcp.f32 %v2165_v20  ;;  %v2166_v45 = vadd.f32 1.0, %v3133_v21  ;;  %v3135_v51 = vpop.eup %3134 }
 0x744   :  { %v3137_v19 = vpop.eup %3136  ;;  %v2167_v8 = vadd.f32 1.0, %v3135_v51 }
 0x745   :  { %3140 = vrcp.f32 %v2166_v45  ;;  %v4088_v45 = vld [vmem:[#allocation31_spill] sm:$0xff] }
 0x746   :  { %3142 = vrcp.f32 %v2167_v8 }
 0x750   :  { %v3139_v38 = vpop.eup %3138 }
 0x751   :  { %v2176_v54 = vmul.f32 %v3139_v38, %v3137_v19 }
 0x752   :  { %v3141_v9 = vpop.eup %3140 }
 0x753   :  { %v2175_v24 = vmul.f32 %v3141_v9, %v3917_v7  ;;  %v3143_v33 = vpop.eup %3142 }
 0x755   :  { %v3959_v23 = vadd.f32 %v2176_v54, %v2175_v24  ;;  %v4089_v24 = vld [vmem:[#allocation29_spill] sm:$0xff] }
 0x757   :  { %3144 = vtanh.f32 %v3959_v23 }
 0x764   :  { %v3145_v10 = vpop.eup %3144 }
 0x765   :  { %v2179_v12 = vmul.f32 %v3145_v10, %v3143_v33  ;;  %v4090_v10 = vld [vmem:[#allocation24_spill] sm:$0xff] }
 0x767   :  { %v2185_v16 = vpack.c.bf16 %v2179_v12, %v2179_v12 }
 0x769   :  { %2219 = vmatmul.mubr.bf16.vlgmr.msra.gmra.mxu1 %v2185_v16  ;;  %2260 = vmatmul.mubr.bf16.vlgmr.msra.gmra.mxu0 %v2185_v16 }
 0x76a   :  { %2303 = vmatpush1.bf16.msra.mxu1 %v3746_v55  ;;  %2344 = vmatpush1.bf16.msra.mxu0 %v3748_v36  ;;  %v4083_v36 = vld [vmem:[#allocation26_spill] sm:$0xff] }
 0x76b   :  { %2304 = vmatprep.subr.bf16.mxu1 %v3750_v56  ;;  %2345 = vmatprep.subr.bf16.mxu0 %v3754_v30 }
 0x76c   :  { %2334 = vmatprep.mubr.bf16.mxu1 %v4062_v39  ;;  %2375 = vmatprep.mubr.bf16.mxu0 %v4062_v39 }
 0x76e   :  { %2305 = vmatpush1.bf16.msra.mxu1 %v3756_v22  ;;  %2346 = vmatpush1.bf16.msra.mxu0 %v3760_v35 }
 0x76f   :  { %2306 = vmatprep.subr.bf16.mxu1 %v3762_v37  ;;  %2347 = vmatprep.subr.bf16.mxu0 %v3766_v43  ;;  %v4084_v37 = vld [vmem:[#allocation27_spill] sm:$0xff] }
 0x772   :  { %2307 = vmatpush1.bf16.msra.mxu1 %v3770_v28  ;;  %2348 = vmatpush1.bf16.msra.mxu0 %v3772_v47 }
 0x773   :  { %2308 = vmatprep.subr.bf16.mxu1 %v3778_v42  ;;  %2349 = vmatprep.subr.bf16.mxu0 %v3782_v52 }
 0x776   :  { %2309 = vmatpush1.bf16.msra.mxu1 %v3784_v4  ;;  %2350 = vmatpush1.bf16.msra.mxu0 %v3786_v40  ;;  %v4085_v40 = vld [vmem:[#allocation25_spill] sm:$0xff] }
 0x777   :  { %2310 = vmatprep.subr.bf16.mxu1 %v3788_v29  ;;  %2351 = vmatprep.subr.bf16.mxu0 %v3790_v44 }
 0x77a   :  { %2311 = vmatpush1.bf16.msra.mxu1 %v3800_v41  ;;  %2352 = vmatpush1.bf16.msra.mxu0 %v3802_v48  ;;  %v4086_v41 = vld [vmem:[#allocation28_spill] sm:$0xff] }
 0x77b   :  { %2312 = vmatprep.subr.bf16.mxu1 %v3806_v34  ;;  %2353 = vmatprep.subr.bf16.mxu0 %v3808_v57 }
 0x77e   :  { %2313 = vmatpush1.bf16.msra.mxu1 %v3812_v58  ;;  %2354 = vmatpush1.bf16.msra.mxu0 %v3814_v59 }
 0x77f   :  { %2314 = vmatprep.subr.bf16.mxu1 %v3818_v60  ;;  %2355 = vmatprep.subr.bf16.mxu0 %v3820_v61 }
 0x782   :  { %2315 = vmatpush1.bf16.msra.mxu1 %v3824_v62  ;;  %2356 = vmatpush1.bf16.msra.mxu0 %v3826_v63 }
 0x783   :  { %2316 = vmatprep.subr.bf16.mxu1 %v3830_v0  ;;  %2357 = vmatprep.subr.bf16.mxu0 %v3832_v1 }
 0x786   :  { %2317 = vmatpush1.bf16.msra.mxu1 %v3836_v2  ;;  %2358 = vmatpush1.bf16.msra.mxu0 %v3838_v3 }
 0x787   :  { %2819 = vmatprep.subr.bf16.mxu1 %v3299_v49 }
 0x829   :  { %v2220_v39 = vpop.f32.mrf.mxu1  ;;  %v2261_v55 = vpop.f32.mrf.mxu0 }
 0x82a   :  { %v2268_v56 = vadd.f32 %v2220_v39, %v4083_v36  ;;  %v2270_v29 = vadd.f32 %v2261_v55, %v4085_v40 }
 0x82b   :  { %v2222_v30 = vpop.f32.mrf.mxu1  ;;  %v2263_v22 = vpop.f32.mrf.mxu0 }
 0x82c   :  { %v2746_v35 = vmul.f32 -1.442695, %v2268_v56  ;;  %v2269_v43 = vadd.f32 %v2222_v30, %v4084_v37  ;;  %v2748_v44 = vmul.f32 -1.442695, %v2270_v29  ;;  %v2271_v48 = vadd.f32 %v2263_v22, %v4086_v41  ;;  %v2752_v29 = vld [vmem:[%s4044_s7] ss:$0 sm:$0xff] }
 0x82d   :  { %v2224_v28 = vpop.f32.mrf.mxu1  ;;  %v2265_v47 = vpop.f32.mrf.mxu0 }
 0x82e   :  { %3146 = vpow2.f32 %v2746_v35  ;;  %v2747_v42 = vmul.f32 -1.442695, %v2269_v43 }
 0x82f   :  { %v2225_v52 = vpop.f32.mrf.mxu1  ;;  %v2266_v4 = vpop.f32.mrf.mxu0 }
 0x830   :  { %3148 = vpow2.f32 %v2747_v42 }
 0x831   :  { %3150 = vpow2.f32 %v2748_v44 }
 0x832   :  { %3152 = vtanh.f32 %v2271_v48 }
 0x83b   :  { %v3147_v34 = vpop.eup %3146 }
 0x83c   :  { %v2281_v57 = vadd.f32 1.0, %v3147_v34 }
 0x83d   :  { %v3149_v58 = vpop.eup %3148 }
 0x83e   :  { %3154 = vrcp.f32 %v2281_v57  ;;  %v2282_v59 = vadd.f32 1.0, %v3149_v58  ;;  %v3151_v60 = vpop.eup %3150 }
 0x83f   :  { %v3153_v61 = vpop.eup %3152  ;;  %v2283_v1 = vadd.f32 1.0, %v3151_v60 }
 0x840   :  { %3156 = vrcp.f32 %v2282_v59 }
 0x841   :  { %3158 = vrcp.f32 %v2283_v1 }
 0x84b   :  { %v3155_v62 = vpop.eup %3154 }
 0x84c   :  { %v2292_v63 = vmul.f32 %v3155_v62, %v3153_v61 }
 0x84d   :  { %v3157_v0 = vpop.eup %3156 }
 0x84e   :  { %v2291_v2 = vmul.f32 %v3157_v0, %v3959_v23  ;;  %v3159_v7 = vpop.eup %3158 }
 0x850   :  { %v3999_v3 = vadd.f32 %v2292_v63, %v2291_v2 }
 0x852   :  { %3160 = vtanh.f32 %v3999_v3 }
 0x85f   :  { %v3161_v17 = vpop.eup %3160 }
 0x860   :  { %v2295_v53 = vmul.f32 %v3161_v17, %v3159_v7 }
 0x862   :  { %v2301_v18 = vpack.c.bf16 %v2295_v53, %v2295_v53 }
 0x864   :  { %2335 = vmatmul.mubr.bf16.vlgmr.msra.gmra.mxu1 %v2301_v18  ;;  %2376 = vmatmul.mubr.bf16.vlgmr.msra.gmra.mxu0 %v2301_v18 }
 0x865   :  { %2820 = vmatpush3.bf16.msra.mxu1 %v3106_v25  ;;  %2835 = vmatprep.mubr.msk.bf16.mxu1 %vm3300_vm2, %v3299_v49 }
 0x866   :  { %2821 = vmatprep.subr.bf16.mxu1 %v3299_v49 }
 0x869   :  { %2822 = vmatpush3.bf16.msra.mxu1 %v3107_v50 }
 0x86a   :  { %2823 = vmatprep.subr.bf16.mxu1 %v3299_v49 }
 0x86d   :  { %2824 = vmatpush3.bf16.msra.mxu1 %v3108_v26 }
 0x86e   :  { %2825 = vmatprep.subr.bf16.mxu1 %v3299_v49 }
 0x871   :  { %2826 = vmatpush3.bf16.msra.mxu1 %v3109_v31 }
 0x872   :  { %2827 = vmatprep.subr.bf16.mxu1 %v3299_v49 }
 0x875   :  { %2828 = vmatpush3.bf16.msra.mxu1 %v3110_v27 }
 0x876   :  { %2829 = vmatprep.subr.bf16.mxu1 %v3299_v49 }
 0x879   :  { %2830 = vmatpush3.bf16.msra.mxu1 %v3111_v5 }
 0x87a   :  { %2831 = vmatprep.subr.bf16.mxu1 %v3299_v49 }
 0x87d   :  { %2832 = vmatpush3.bf16.msra.mxu1 %v3112_v13 }
 0x87e   :  { %2833 = vmatprep.subr.bf16.mxu1 %v3299_v49 }
 0x881   :  { %2834 = vmatpush3.bf16.msra.mxu1 %v3113_v15 }
 0x924   :  { %v2336_v6 = vpop.f32.mrf.mxu1  ;;  %v2377_v46 = vpop.f32.mrf.mxu0 }
 0x925   :  { %v2384_v32 = vadd.f32 %v2336_v6, %v4087_v14  ;;  %v2386_v23 = vadd.f32 %v2377_v46, %v4089_v24 }
 0x926   :  { %v2338_v11 = vpop.f32.mrf.mxu1  ;;  %v2379_v20 = vpop.f32.mrf.mxu0 }
 0x927   :  { %v2749_v21 = vmul.f32 -1.442695, %v2384_v32  ;;  %v2385_v51 = vadd.f32 %v2338_v11, %v4088_v45  ;;  %v2751_v33 = vmul.f32 -1.442695, %v2386_v23  ;;  %v2387_v12 = vadd.f32 %v2379_v20, %v4090_v10 }
 0x928   :  { %v2340_v19 = vpop.f32.mrf.mxu1  ;;  %v2381_v38 = vpop.f32.mrf.mxu0 }
 0x929   :  { %3162 = vpow2.f32 %v2749_v21  ;;  %v2750_v54 = vmul.f32 -1.442695, %v2385_v51 }
 0x92a   :  { %v2341_v9 = vpop.f32.mrf.mxu1  ;;  %v2382_v8 = vpop.f32.mrf.mxu0 }
 0x92b   :  { %3164 = vpow2.f32 %v2750_v54 }
 0x92c   :  { %3166 = vpow2.f32 %v2751_v33 }
 0x92d   :  { %3168 = vtanh.f32 %v2387_v12 }
 0x936   :  { %v3163_v16 = vpop.eup %3162 }
 0x937   :  { %v2397_v39 = vadd.f32 1.0, %v3163_v16 }
 0x938   :  { %v3165_v55 = vpop.eup %3164 }
 0x939   :  { %3170 = vrcp.f32 %v2397_v39  ;;  %v2398_v36 = vadd.f32 1.0, %v3165_v55  ;;  %v3167_v56 = vpop.eup %3166 }
 0x93a   :  { %v3169_v30 = vpop.eup %3168  ;;  %v2399_v43 = vadd.f32 1.0, %v3167_v56 }
 0x93b   :  { %3172 = vrcp.f32 %v2398_v36 }
 0x93c   :  { %3174 = vrcp.f32 %v2399_v43 }
 0x946   :  { %v3171_v22 = vpop.eup %3170 }
 0x947   :  { %v2408_v35 = vmul.f32 %v3171_v22, %v3169_v30 }
 0x948   :  { %v3173_v37 = vpop.eup %3172 }
 0x949   :  { %v2407_v28 = vmul.f32 %v3173_v37, %v3999_v3  ;;  %v3175_v42 = vpop.eup %3174 }
 0x94b   :  { %v2409_v47 = vadd.f32 %v2408_v35, %v2407_v28 }
 0x94d   :  { %3176 = vtanh.f32 %v2409_v47 }
 0x95a   :  { %v3177_v52 = vpop.eup %3176 }
 0x95b   :  { %v2411_v4 = vmul.f32 %v3177_v52, %v3175_v42 }
 0x95d   :  { %v2413_v40 = vpack.c.bf16 %v2411_v4, %v2411_v4 }
 0x95f   :  { %2836 = vmatmul.mubr.bf16.vlgmr.msra.gmra.mxu1 %v2413_v40 }
 0xa1f   :  { %v2519_v44 = vpop.f32.mrf.mxu1 }
 0xa20   :  { %v2520_v41 = vadd.f32 %v2752_v29, %v2519_v44 }
 0xa21   :  { %v2837_v48 = vpop.f32.mrf.mxu1 }
 0xa22   :  { %2526 = vst.msk [vmem:[#allocation7] sm:$0xff] %vm2525_vm3, %v2520_v41 }
 0xa23   :  { %v2522_v34 = vpop.f32.mrf.mxu1 }
 0xa24   :  { %3275 = shalt.err (!%p3272_p10)
}
 0xa25   :  { %2536 = dma.vmem_to_hbm [thread:$0]  %s2534_s25, 128, %s4045_s8, [#allocation8]   ;;  %v2838_v57 = vpop.f32.mrf.mxu1 }
 0xa26   :  { %3292 = dma.done.wait [#allocation8], 128  }
 0xa27   :  { %3293 = vsyncadd [#allocation8], 4294967168 }
 0xa28   :  { %2540 = vsyncpa [#allocation8], 1 }
 0xa29   :  { %2541 = vsyncmov [#allocation6] }
 0xa2c   :  { %s2542_s7 = vpop.sfrf %2541 }
 0xa2d   :  { %p2761_p11 = scmp.ne.s32.totalorder %s2542_s7, 0 }
 0xa2f   :  { %2546 = shalt.err (%p2761_p11)  }
 0xa30   :  { %2548 = vsyncmov [#allocation6 + $0x1] }
 0xa33   :  { %s2549_s28 = vpop.sfrf %2548 }
 0xa34   :  { %p2762_p12 = scmp.ne.s32.totalorder %s2549_s28, 0 }
 0xa36   :  { %2553 = shalt.err (%p2762_p12)  }
 0xa37   :  { %2555 = vsyncmov [#allocation6 + $0x2] }
 0xa3a   :  { %s2556_s4 = vpop.sfrf %2555 }
 0xa3b   :  { %p2763_p13 = scmp.ne.s32.totalorder %s2556_s4, 0 }
 0xa3d   :  { %2560 = shalt.err (%p2763_p13)  }
 0xa3e   :  { %2562 = vsyncmov [#allocation6 + $0x3] }
 0xa41   :  { %s2563_s29 = vpop.sfrf %2562 }
 0xa42   :  { %p2764_p0 = scmp.ne.s32.totalorder %s2563_s29, 0 }
 0xa44   :  { %2567 = shalt.err (%p2764_p0)  }

</bundles_post_ra>
